<compile_context>
chip_gen: v5e
topology: v5e:2x2
jax: 0.10.0
libtpu: 0.0.40
codegen_flags: <defaults>
</compile_context>

<pallas_src>
import math

import jax
import jax.numpy as jnp
import numpy as np
from jax.experimental import pallas as pl
from jax.experimental.pallas import tpu as pltpu

# --- model hyper-parameters (module defaults, small batch/seq) ---------------
FEAT_DIM = 256
NUM_HEADS = 4
HEAD_DIM = FEAT_DIM // NUM_HEADS
BATCH = 2
SEQ = 8

COMPUTE_DTYPE = jnp.bfloat16   # weights / MXU operands; accumulation stays f32


def make_kernel(batch, seq, feat, num_heads, compute_dtype):
    head_dim = feat // num_heads
    bt = batch * seq

    def kernel(x_ref, w_ref, b_ref, o_ref):
        """Single invocation: whole problem resident in VMEM.

        x_ref : (2*B*T, F)  rows 0:BT = x_current, rows BT:2BT = x_past (bf16)
        w_ref : (F, 4F)     [Wq*scale | Wk | Wv | Wo], stored (in, out), bf16
        b_ref : (1, 4F)     [bq*scale | bk | bv | bo], bf16
        o_ref : (B*T, F)    output, f32
        """
        # ---- fused QKV projection: one (2BT, F) x (F, 3F) MXU pass ---------
        qkv = jnp.dot(x_ref[...], w_ref[:, 0:3 * feat],
                      preferred_element_type=jnp.float32)      # (2BT, 3F) f32
        qkv = qkv + b_ref[:, 0:3 * feat].astype(jnp.float32)   # broadcast bias

        bo = b_ref[:, 3 * feat:4 * feat].astype(jnp.float32)   # (1, F)

        for b in range(batch):
            rq = b * seq            # x_current rows for this batch element
            rk = bt + b * seq       # x_past rows for this batch element
            q_b = qkv[rq:rq + seq, 0:feat]                     # (T, F)
            k_b = qkv[rk:rk + seq, feat:2 * feat]              # (T, F)
            v_b = qkv[rk:rk + seq, 2 * feat:3 * feat]          # (T, F)

            acc = jnp.zeros((seq, feat), jnp.float32)          # sum_h ctx_h @ Wo_h
            for h in range(num_heads):
                lo = h * head_dim
                hi = lo + head_dim
                qh = q_b[:, lo:hi]                             # (T, Dh)
                kh = k_b[:, lo:hi]
                vh = v_b[:, lo:hi]
                # Q @ K^T (scale already folded into Wq); contraction over the
                # last dims, no transposed copy of K is materialized.
                s = jnp.einsum("qd,kd->qk", qh, kh,
                               preferred_element_type=jnp.float32)  # (T, T)
                m = jnp.max(s, axis=-1, keepdims=True)
                e = jnp.exp(s - m)
                p = e / jnp.sum(e, axis=-1, keepdims=True)
                ctx = jnp.dot(p, vh,
                              preferred_element_type=jnp.float32)   # (T, Dh)
                # Accumulate the output projection per head instead of the
                # lane-unaligned 64-lane concatenate.
                acc = acc + jnp.dot(ctx.astype(compute_dtype),
                                    w_ref[lo:hi, 3 * feat:4 * feat],
                                    preferred_element_type=jnp.float32)
            # Lane-dense (multiple-of-128), sublane-aligned store.
            o_ref[rq:rq + seq, :] = (acc + bo).astype(o_ref.dtype)

    return kernel


def prepare_params(params, dtype=COMPUTE_DTYPE):
    """Pack the 4 Linear layers once (hoisted out of the per-call path).

    Weights stored (in, out); 1/sqrt(head_dim) folded into Wq / bq.
    Returns (w_all (F, 4F), b_all (1, 4F)) in `dtype`.
    """
    (wq, bq), (wk, bk), (wv, bv), (wo, bo) = params
    scale = 1.0 / math.sqrt(HEAD_DIM)
    w_all = jnp.concatenate([wq * scale, wk, wv, wo], axis=1).astype(dtype)
    b_all = jnp.concatenate([bq * scale, bk, bv, bo], axis=1).astype(dtype)
    return w_all, b_all


def historical_cross_attention(x_current, x_past, w_all, b_all):
    """x_current, x_past: (B, T, F) f32.  w_all: (F, 4F), b_all: (1, 4F)."""
    B, T, F = x_current.shape
    # Stack current + past rows (layout plumbing, sublane aligned) so the
    # kernel does ONE fused QKV matmul for both sequences and both batches.
    x_cat = jnp.concatenate(
        [x_current.reshape(B * T, F), x_past.reshape(B * T, F)], axis=0
    ).astype(COMPUTE_DTYPE)                                    # (2BT, F)

    out_flat = pl.pallas_call(
        make_kernel(B, T, F, NUM_HEADS, COMPUTE_DTYPE),
        out_shape=jax.ShapeDtypeStruct((B * T, F), jnp.float32),
        grid_spec=pltpu.PrefetchScalarGridSpec(
            num_scalar_prefetch=0,
            grid=(1,),                                   # single step (see review)
            in_specs=[
                pl.BlockSpec((2 * B * T, F), lambda i: (0, 0)),   # activations
                pl.BlockSpec((F, 4 * F), lambda i: (0, 0)),       # fused weights
                pl.BlockSpec((1, 4 * F), lambda i: (0, 0)),       # fused biases
            ],
            out_specs=pl.BlockSpec((B * T, F), lambda i: (0, 0)),
        ),
        compiler_params=pltpu.CompilerParams(
            dimension_semantics=("arbitrary",)),
    )(x_cat, w_all, b_all)
    return out_flat.reshape(B, T, F)


# --- pure-JAX f32 reference (mirrors the PyTorch forward exactly) -------------
def historical_cross_attention_ref(x_current, x_past, params):
    B, T, F = x_current.shape
    (wq, bq), (wk, bk), (wv, bv), (wo, bo) = params
    q = x_current @ wq + bq
    k = x_past @ wk + bk
    v = x_past @ wv + bv

    def split(t):  # (B, T, F) -> (B, H, T, Dh)
        return t.reshape(B, T, NUM_HEADS, HEAD_DIM).transpose(0, 2, 1, 3)

    qh, kh, vh = split(q), split(k), split(v)
    scores = jnp.einsum("bhqd,bhkd->bhqk", qh, kh) / math.sqrt(HEAD_DIM)
    attn = jax.nn.softmax(scores, axis=-1)
    out = jnp.einsum("bhqk,bhkd->bhqd", attn, vh)
    out = out.transpose(0, 2, 1, 3).reshape(B, T, F)
    return out @ wo + bo


def make_params(key, feat_dim):
    """Deterministic synthetic weights, stored (in, out) + (1, out)."""
    keys = jax.random.split(key, 8)
    scale = 1.0 / math.sqrt(feat_dim)
    params = []
    for i in range(4):
        w = jax.random.uniform(keys[2 * i], (feat_dim, feat_dim),
                               jnp.float32, -scale, scale)
        b = jax.random.uniform(keys[2 * i + 1], (1, feat_dim),
                               jnp.float32, -scale, scale)
        params.append((w, b))
    return tuple(params)


if __name__ == "__main__":
    key = jax.random.PRNGKey(0)
    kc, kp, kw = jax.random.split(key, 3)

    x_current = jax.random.normal(kc, (BATCH, SEQ, FEAT_DIM), jnp.float32)
    x_past = jax.random.normal(kp, (BATCH, SEQ, FEAT_DIM), jnp.float32)
    params = make_params(kw, FEAT_DIM)

    # Host-side packing done once, outside the call path.
    w_all, b_all = prepare_params(params)

    hca = jax.jit(historical_cross_attention)
    out = jax.block_until_ready(hca(x_current, x_past, w_all, b_all))

    ref = historical_cross_attention_ref(x_current, x_past, params)
    # bf16 weights/operands (f32 accumulation) -> loosened tolerance per review.
    np.testing.assert_allclose(np.asarray(out), np.asarray(ref),
                               rtol=2e-2, atol=2e-2)

    print("KERNEL_OK")
</pallas_src>

<mosaic_0001>
module attributes {stable_mosaic.version = 11 : i64} {
  func.func @kernel(%arg0: i32, %arg1: memref<32x256xbf16, #tpu.memory_space<vmem>>, %arg2: memref<256x1024xbf16, #tpu.memory_space<vmem>>, %arg3: memref<1x1024xbf16, #tpu.memory_space<vmem>>, %arg4: memref<16x256xf32, #tpu.memory_space<vmem>>) attributes {dimension_semantics = [#tpu.dimension_semantics<arbitrary>], iteration_bounds = array<i64: 1>, scalar_prefetch = 0 : i64, scratch_operands = 0 : i64, tpu.core_type = #tpu.core_type<tc>, window_params = [{pipeline_mode = #tpu.pipeline_mode<synchronous>, transform_indices = @transform_0, window_bounds = array<i64: 32, 256>}, {pipeline_mode = #tpu.pipeline_mode<synchronous>, transform_indices = @transform_1, window_bounds = array<i64: 256, 1024>}, {pipeline_mode = #tpu.pipeline_mode<synchronous>, transform_indices = @transform_2, window_bounds = array<i64: 1, 1024>}, {pipeline_mode = #tpu.pipeline_mode<synchronous>, transform_indices = @transform_3, window_bounds = array<i64: 16, 256>}]} {
    %c0 = arith.constant 0 : index
    %c0_0 = arith.constant 0 : index
    %0 = vector.load %arg1[%c0, %c0_0] : memref<32x256xbf16, #tpu.memory_space<vmem>>, vector<32x256xbf16>
    %c0_1 = arith.constant 0 : index
    %c0_2 = arith.constant 0 : index
    %1 = vector.load %arg2[%c0_1, %c0_2] : memref<256x1024xbf16, #tpu.memory_space<vmem>>, vector<256x768xbf16>
    %cst = arith.constant dense<0.000000e+00> : vector<32x768xf32>
    %2 = tpu.matmul %0, %1, %cst {dimension_numbers = #tpu.dot_dimension_numbers<[1], [0], [0], [1], [0, 0, 1, 1], [], []>} : vector<32x256xbf16>, vector<256x768xbf16>, vector<32x768xf32> -> vector<32x768xf32>
    %c0_3 = arith.constant 0 : index
    %c0_4 = arith.constant 0 : index
    %3 = vector.load %arg3[%c0_3, %c0_4] : memref<1x1024xbf16, #tpu.memory_space<vmem>>, vector<1x768xbf16>
    %4 = arith.extf %3 : vector<1x768xbf16> to vector<1x768xf32>
    %5 = vector.broadcast %4 : vector<1x768xf32> to vector<32x768xf32>
    %6 = arith.addf %2, %5 : vector<32x768xf32>
    %c0_5 = arith.constant 0 : index
    %c768 = arith.constant 768 : index
    %7 = vector.load %arg3[%c0_5, %c768] : memref<1x1024xbf16, #tpu.memory_space<vmem>>, vector<1x256xbf16>
    %8 = arith.extf %7 : vector<1x256xbf16> to vector<1x256xf32>
    %9 = vector.extract_strided_slice %6 {offsets = [0, 0], sizes = [8, 256], strides = [1, 1]} : vector<32x768xf32> to vector<8x256xf32>
    %10 = vector.extract_strided_slice %6 {offsets = [16, 256], sizes = [8, 256], strides = [1, 1]} : vector<32x768xf32> to vector<8x256xf32>
    %11 = vector.extract_strided_slice %6 {offsets = [16, 512], sizes = [8, 256], strides = [1, 1]} : vector<32x768xf32> to vector<8x256xf32>
    %cst_6 = arith.constant 0.000000e+00 : f32
    %12 = vector.broadcast %cst_6 : f32 to vector<8x256xf32>
    %13 = vector.extract_strided_slice %9 {offsets = [0, 0], sizes = [8, 64], strides = [1, 1]} : vector<8x256xf32> to vector<8x64xf32>
    %14 = vector.extract_strided_slice %10 {offsets = [0, 0], sizes = [8, 64], strides = [1, 1]} : vector<8x256xf32> to vector<8x64xf32>
    %15 = vector.extract_strided_slice %11 {offsets = [0, 0], sizes = [8, 64], strides = [1, 1]} : vector<8x256xf32> to vector<8x64xf32>
    "tpu.trace_start"() <{level = 10 : i32, message = "qd,kd->qk"}> : () -> ()
    %cst_7 = arith.constant dense<0.000000e+00> : vector<8x8xf32>
    %16 = tpu.matmul %13, %14, %cst_7 {dimension_numbers = #tpu.dot_dimension_numbers<[1], [1], [0], [0], [0, 0, 1, 0], [], []>} : vector<8x64xf32>, vector<8x64xf32>, vector<8x8xf32> -> vector<8x8xf32>
    "tpu.trace_stop"() : () -> ()
    %cst_8 = arith.constant dense<0xFF800000> : vector<8xf32>
    %17 = vector.multi_reduction <maximumf>, %16, %cst_8 [1] : vector<8x8xf32> to vector<8xf32>
    %18 = vector.shape_cast %17 : vector<8xf32> to vector<8x1xf32>
    %19 = vector.broadcast %18 : vector<8x1xf32> to vector<8x8xf32>
    %20 = arith.subf %16, %19 : vector<8x8xf32>
    %21 = math.exp %20 : vector<8x8xf32>
    %cst_9 = arith.constant dense<0.000000e+00> : vector<8xf32>
    %22 = vector.multi_reduction <add>, %21, %cst_9 [1] : vector<8x8xf32> to vector<8xf32>
    %23 = vector.shape_cast %22 : vector<8xf32> to vector<8x1xf32>
    %24 = vector.broadcast %23 : vector<8x1xf32> to vector<8x8xf32>
    %25 = arith.divf %21, %24 : vector<8x8xf32>
    %cst_10 = arith.constant dense<0.000000e+00> : vector<8x64xf32>
    %26 = tpu.matmul %25, %15, %cst_10 {dimension_numbers = #tpu.dot_dimension_numbers<[1], [0], [0], [1], [0, 0, 1, 1], [], []>} : vector<8x8xf32>, vector<8x64xf32>, vector<8x64xf32> -> vector<8x64xf32>
    %27 = arith.truncf %26 : vector<8x64xf32> to vector<8x64xbf16>
    %c0_11 = arith.constant 0 : index
    %c768_12 = arith.constant 768 : index
    %28 = vector.load %arg2[%c0_11, %c768_12] : memref<256x1024xbf16, #tpu.memory_space<vmem>>, vector<64x256xbf16>
    %cst_13 = arith.constant dense<0.000000e+00> : vector<8x256xf32>
    %29 = tpu.matmul %27, %28, %cst_13 {dimension_numbers = #tpu.dot_dimension_numbers<[1], [0], [0], [1], [0, 0, 1, 1], [], []>} : vector<8x64xbf16>, vector<64x256xbf16>, vector<8x256xf32> -> vector<8x256xf32>
    %30 = arith.addf %12, %29 : vector<8x256xf32>
    %31 = vector.extract_strided_slice %9 {offsets = [0, 64], sizes = [8, 64], strides = [1, 1]} : vector<8x256xf32> to vector<8x64xf32>
    %32 = vector.extract_strided_slice %10 {offsets = [0, 64], sizes = [8, 64], strides = [1, 1]} : vector<8x256xf32> to vector<8x64xf32>
    %33 = vector.extract_strided_slice %11 {offsets = [0, 64], sizes = [8, 64], strides = [1, 1]} : vector<8x256xf32> to vector<8x64xf32>
    "tpu.trace_start"() <{level = 10 : i32, message = "qd,kd->qk"}> : () -> ()
    %cst_14 = arith.constant dense<0.000000e+00> : vector<8x8xf32>
    %34 = tpu.matmul %31, %32, %cst_14 {dimension_numbers = #tpu.dot_dimension_numbers<[1], [1], [0], [0], [0, 0, 1, 0], [], []>} : vector<8x64xf32>, vector<8x64xf32>, vector<8x8xf32> -> vector<8x8xf32>
    "tpu.trace_stop"() : () -> ()
    %cst_15 = arith.constant dense<0xFF800000> : vector<8xf32>
    %35 = vector.multi_reduction <maximumf>, %34, %cst_15 [1] : vector<8x8xf32> to vector<8xf32>
    %36 = vector.shape_cast %35 : vector<8xf32> to vector<8x1xf32>
    %37 = vector.broadcast %36 : vector<8x1xf32> to vector<8x8xf32>
    %38 = arith.subf %34, %37 : vector<8x8xf32>
    %39 = math.exp %38 : vector<8x8xf32>
    %cst_16 = arith.constant dense<0.000000e+00> : vector<8xf32>
    %40 = vector.multi_reduction <add>, %39, %cst_16 [1] : vector<8x8xf32> to vector<8xf32>
    %41 = vector.shape_cast %40 : vector<8xf32> to vector<8x1xf32>
    %42 = vector.broadcast %41 : vector<8x1xf32> to vector<8x8xf32>
    %43 = arith.divf %39, %42 : vector<8x8xf32>
    %cst_17 = arith.constant dense<0.000000e+00> : vector<8x64xf32>
    %44 = tpu.matmul %43, %33, %cst_17 {dimension_numbers = #tpu.dot_dimension_numbers<[1], [0], [0], [1], [0, 0, 1, 1], [], []>} : vector<8x8xf32>, vector<8x64xf32>, vector<8x64xf32> -> vector<8x64xf32>
    %45 = arith.truncf %44 : vector<8x64xf32> to vector<8x64xbf16>
    %c64 = arith.constant 64 : index
    %c768_18 = arith.constant 768 : index
    %46 = vector.load %arg2[%c64, %c768_18] : memref<256x1024xbf16, #tpu.memory_space<vmem>>, vector<64x256xbf16>
    %cst_19 = arith.constant dense<0.000000e+00> : vector<8x256xf32>
    %47 = tpu.matmul %45, %46, %cst_19 {dimension_numbers = #tpu.dot_dimension_numbers<[1], [0], [0], [1], [0, 0, 1, 1], [], []>} : vector<8x64xbf16>, vector<64x256xbf16>, vector<8x256xf32> -> vector<8x256xf32>
    %48 = arith.addf %30, %47 : vector<8x256xf32>
    %49 = vector.extract_strided_slice %9 {offsets = [0, 128], sizes = [8, 64], strides = [1, 1]} : vector<8x256xf32> to vector<8x64xf32>
    %50 = vector.extract_strided_slice %10 {offsets = [0, 128], sizes = [8, 64], strides = [1, 1]} : vector<8x256xf32> to vector<8x64xf32>
    %51 = vector.extract_strided_slice %11 {offsets = [0, 128], sizes = [8, 64], strides = [1, 1]} : vector<8x256xf32> to vector<8x64xf32>
    "tpu.trace_start"() <{level = 10 : i32, message = "qd,kd->qk"}> : () -> ()
    %cst_20 = arith.constant dense<0.000000e+00> : vector<8x8xf32>
    %52 = tpu.matmul %49, %50, %cst_20 {dimension_numbers = #tpu.dot_dimension_numbers<[1], [1], [0], [0], [0, 0, 1, 0], [], []>} : vector<8x64xf32>, vector<8x64xf32>, vector<8x8xf32> -> vector<8x8xf32>
    "tpu.trace_stop"() : () -> ()
    %cst_21 = arith.constant dense<0xFF800000> : vector<8xf32>
    %53 = vector.multi_reduction <maximumf>, %52, %cst_21 [1] : vector<8x8xf32> to vector<8xf32>
    %54 = vector.shape_cast %53 : vector<8xf32> to vector<8x1xf32>
    %55 = vector.broadcast %54 : vector<8x1xf32> to vector<8x8xf32>
    %56 = arith.subf %52, %55 : vector<8x8xf32>
    %57 = math.exp %56 : vector<8x8xf32>
    %cst_22 = arith.constant dense<0.000000e+00> : vector<8xf32>
    %58 = vector.multi_reduction <add>, %57, %cst_22 [1] : vector<8x8xf32> to vector<8xf32>
    %59 = vector.shape_cast %58 : vector<8xf32> to vector<8x1xf32>
    %60 = vector.broadcast %59 : vector<8x1xf32> to vector<8x8xf32>
    %61 = arith.divf %57, %60 : vector<8x8xf32>
    %cst_23 = arith.constant dense<0.000000e+00> : vector<8x64xf32>
    %62 = tpu.matmul %61, %51, %cst_23 {dimension_numbers = #tpu.dot_dimension_numbers<[1], [0], [0], [1], [0, 0, 1, 1], [], []>} : vector<8x8xf32>, vector<8x64xf32>, vector<8x64xf32> -> vector<8x64xf32>
    %63 = arith.truncf %62 : vector<8x64xf32> to vector<8x64xbf16>
    %c128 = arith.constant 128 : index
    %c768_24 = arith.constant 768 : index
    %64 = vector.load %arg2[%c128, %c768_24] : memref<256x1024xbf16, #tpu.memory_space<vmem>>, vector<64x256xbf16>
    %cst_25 = arith.constant dense<0.000000e+00> : vector<8x256xf32>
    %65 = tpu.matmul %63, %64, %cst_25 {dimension_numbers = #tpu.dot_dimension_numbers<[1], [0], [0], [1], [0, 0, 1, 1], [], []>} : vector<8x64xbf16>, vector<64x256xbf16>, vector<8x256xf32> -> vector<8x256xf32>
    %66 = arith.addf %48, %65 : vector<8x256xf32>
    %67 = vector.extract_strided_slice %9 {offsets = [0, 192], sizes = [8, 64], strides = [1, 1]} : vector<8x256xf32> to vector<8x64xf32>
    %68 = vector.extract_strided_slice %10 {offsets = [0, 192], sizes = [8, 64], strides = [1, 1]} : vector<8x256xf32> to vector<8x64xf32>
    %69 = vector.extract_strided_slice %11 {offsets = [0, 192], sizes = [8, 64], strides = [1, 1]} : vector<8x256xf32> to vector<8x64xf32>
    "tpu.trace_start"() <{level = 10 : i32, message = "qd,kd->qk"}> : () -> ()
    %cst_26 = arith.constant dense<0.000000e+00> : vector<8x8xf32>
    %70 = tpu.matmul %67, %68, %cst_26 {dimension_numbers = #tpu.dot_dimension_numbers<[1], [1], [0], [0], [0, 0, 1, 0], [], []>} : vector<8x64xf32>, vector<8x64xf32>, vector<8x8xf32> -> vector<8x8xf32>
    "tpu.trace_stop"() : () -> ()
    %cst_27 = arith.constant dense<0xFF800000> : vector<8xf32>
    %71 = vector.multi_reduction <maximumf>, %70, %cst_27 [1] : vector<8x8xf32> to vector<8xf32>
    %72 = vector.shape_cast %71 : vector<8xf32> to vector<8x1xf32>
    %73 = vector.broadcast %72 : vector<8x1xf32> to vector<8x8xf32>
    %74 = arith.subf %70, %73 : vector<8x8xf32>
    %75 = math.exp %74 : vector<8x8xf32>
    %cst_28 = arith.constant dense<0.000000e+00> : vector<8xf32>
    %76 = vector.multi_reduction <add>, %75, %cst_28 [1] : vector<8x8xf32> to vector<8xf32>
    %77 = vector.shape_cast %76 : vector<8xf32> to vector<8x1xf32>
    %78 = vector.broadcast %77 : vector<8x1xf32> to vector<8x8xf32>
    %79 = arith.divf %75, %78 : vector<8x8xf32>
    %cst_29 = arith.constant dense<0.000000e+00> : vector<8x64xf32>
    %80 = tpu.matmul %79, %69, %cst_29 {dimension_numbers = #tpu.dot_dimension_numbers<[1], [0], [0], [1], [0, 0, 1, 1], [], []>} : vector<8x8xf32>, vector<8x64xf32>, vector<8x64xf32> -> vector<8x64xf32>
    %81 = arith.truncf %80 : vector<8x64xf32> to vector<8x64xbf16>
    %c192 = arith.constant 192 : index
    %c768_30 = arith.constant 768 : index
    %82 = vector.load %arg2[%c192, %c768_30] : memref<256x1024xbf16, #tpu.memory_space<vmem>>, vector<64x256xbf16>
    %cst_31 = arith.constant dense<0.000000e+00> : vector<8x256xf32>
    %83 = tpu.matmul %81, %82, %cst_31 {dimension_numbers = #tpu.dot_dimension_numbers<[1], [0], [0], [1], [0, 0, 1, 1], [], []>} : vector<8x64xbf16>, vector<64x256xbf16>, vector<8x256xf32> -> vector<8x256xf32>
    %84 = arith.addf %66, %83 : vector<8x256xf32>
    %85 = vector.broadcast %8 : vector<1x256xf32> to vector<8x256xf32>
    %86 = arith.addf %84, %85 : vector<8x256xf32>
    %c0_32 = arith.constant 0 : index
    %c0_33 = arith.constant 0 : index
    %87 = vector.load %arg4[%c0_32, %c0_33] : memref<16x256xf32, #tpu.memory_space<vmem>>, vector<8x256xf32>
    tpu.vector_store %arg4[%c0_32, %c0_33], %86 {strides = array<i32>} : memref<16x256xf32, #tpu.memory_space<vmem>>, vector<8x256xf32>,
    %88 = vector.extract_strided_slice %6 {offsets = [8, 0], sizes = [8, 256], strides = [1, 1]} : vector<32x768xf32> to vector<8x256xf32>
    %89 = vector.extract_strided_slice %6 {offsets = [24, 256], sizes = [8, 256], strides = [1, 1]} : vector<32x768xf32> to vector<8x256xf32>
    %90 = vector.extract_strided_slice %6 {offsets = [24, 512], sizes = [8, 256], strides = [1, 1]} : vector<32x768xf32> to vector<8x256xf32>
    %cst_34 = arith.constant 0.000000e+00 : f32
    %91 = vector.broadcast %cst_34 : f32 to vector<8x256xf32>
    %92 = vector.extract_strided_slice %88 {offsets = [0, 0], sizes = [8, 64], strides = [1, 1]} : vector<8x256xf32> to vector<8x64xf32>
    %93 = vector.extract_strided_slice %89 {offsets = [0, 0], sizes = [8, 64], strides = [1, 1]} : vector<8x256xf32> to vector<8x64xf32>
    %94 = vector.extract_strided_slice %90 {offsets = [0, 0], sizes = [8, 64], strides = [1, 1]} : vector<8x256xf32> to vector<8x64xf32>
    "tpu.trace_start"() <{level = 10 : i32, message = "qd,kd->qk"}> : () -> ()
    %cst_35 = arith.constant dense<0.000000e+00> : vector<8x8xf32>
    %95 = tpu.matmul %92, %93, %cst_35 {dimension_numbers = #tpu.dot_dimension_numbers<[1], [1], [0], [0], [0, 0, 1, 0], [], []>} : vector<8x64xf32>, vector<8x64xf32>, vector<8x8xf32> -> vector<8x8xf32>
    "tpu.trace_stop"() : () -> ()
    %cst_36 = arith.constant dense<0xFF800000> : vector<8xf32>
    %96 = vector.multi_reduction <maximumf>, %95, %cst_36 [1] : vector<8x8xf32> to vector<8xf32>
    %97 = vector.shape_cast %96 : vector<8xf32> to vector<8x1xf32>
    %98 = vector.broadcast %97 : vector<8x1xf32> to vector<8x8xf32>
    %99 = arith.subf %95, %98 : vector<8x8xf32>
    %100 = math.exp %99 : vector<8x8xf32>
    %cst_37 = arith.constant dense<0.000000e+00> : vector<8xf32>
    %101 = vector.multi_reduction <add>, %100, %cst_37 [1] : vector<8x8xf32> to vector<8xf32>
    %102 = vector.shape_cast %101 : vector<8xf32> to vector<8x1xf32>
    %103 = vector.broadcast %102 : vector<8x1xf32> to vector<8x8xf32>
    %104 = arith.divf %100, %103 : vector<8x8xf32>
    %cst_38 = arith.constant dense<0.000000e+00> : vector<8x64xf32>
    %105 = tpu.matmul %104, %94, %cst_38 {dimension_numbers = #tpu.dot_dimension_numbers<[1], [0], [0], [1], [0, 0, 1, 1], [], []>} : vector<8x8xf32>, vector<8x64xf32>, vector<8x64xf32> -> vector<8x64xf32>
    %106 = arith.truncf %105 : vector<8x64xf32> to vector<8x64xbf16>
    %c0_39 = arith.constant 0 : index
    %c768_40 = arith.constant 768 : index
    %107 = vector.load %arg2[%c0_39, %c768_40] : memref<256x1024xbf16, #tpu.memory_space<vmem>>, vector<64x256xbf16>
    %cst_41 = arith.constant dense<0.000000e+00> : vector<8x256xf32>
    %108 = tpu.matmul %106, %107, %cst_41 {dimension_numbers = #tpu.dot_dimension_numbers<[1], [0], [0], [1], [0, 0, 1, 1], [], []>} : vector<8x64xbf16>, vector<64x256xbf16>, vector<8x256xf32> -> vector<8x256xf32>
    %109 = arith.addf %91, %108 : vector<8x256xf32>
    %110 = vector.extract_strided_slice %88 {offsets = [0, 64], sizes = [8, 64], strides = [1, 1]} : vector<8x256xf32> to vector<8x64xf32>
    %111 = vector.extract_strided_slice %89 {offsets = [0, 64], sizes = [8, 64], strides = [1, 1]} : vector<8x256xf32> to vector<8x64xf32>
    %112 = vector.extract_strided_slice %90 {offsets = [0, 64], sizes = [8, 64], strides = [1, 1]} : vector<8x256xf32> to vector<8x64xf32>
    "tpu.trace_start"() <{level = 10 : i32, message = "qd,kd->qk"}> : () -> ()
    %cst_42 = arith.constant dense<0.000000e+00> : vector<8x8xf32>
    %113 = tpu.matmul %110, %111, %cst_42 {dimension_numbers = #tpu.dot_dimension_numbers<[1], [1], [0], [0], [0, 0, 1, 0], [], []>} : vector<8x64xf32>, vector<8x64xf32>, vector<8x8xf32> -> vector<8x8xf32>
    "tpu.trace_stop"() : () -> ()
    %cst_43 = arith.constant dense<0xFF800000> : vector<8xf32>
    %114 = vector.multi_reduction <maximumf>, %113, %cst_43 [1] : vector<8x8xf32> to vector<8xf32>
    %115 = vector.shape_cast %114 : vector<8xf32> to vector<8x1xf32>
    %116 = vector.broadcast %115 : vector<8x1xf32> to vector<8x8xf32>
    %117 = arith.subf %113, %116 : vector<8x8xf32>
    %118 = math.exp %117 : vector<8x8xf32>
    %cst_44 = arith.constant dense<0.000000e+00> : vector<8xf32>
    %119 = vector.multi_reduction <add>, %118, %cst_44 [1] : vector<8x8xf32> to vector<8xf32>
    %120 = vector.shape_cast %119 : vector<8xf32> to vector<8x1xf32>
    %121 = vector.broadcast %120 : vector<8x1xf32> to vector<8x8xf32>
    %122 = arith.divf %118, %121 : vector<8x8xf32>
    %cst_45 = arith.constant dense<0.000000e+00> : vector<8x64xf32>
    %123 = tpu.matmul %122, %112, %cst_45 {dimension_numbers = #tpu.dot_dimension_numbers<[1], [0], [0], [1], [0, 0, 1, 1], [], []>} : vector<8x8xf32>, vector<8x64xf32>, vector<8x64xf32> -> vector<8x64xf32>
    %124 = arith.truncf %123 : vector<8x64xf32> to vector<8x64xbf16>
    %c64_46 = arith.constant 64 : index
    %c768_47 = arith.constant 768 : index
    %125 = vector.load %arg2[%c64_46, %c768_47] : memref<256x1024xbf16, #tpu.memory_space<vmem>>, vector<64x256xbf16>
    %cst_48 = arith.constant dense<0.000000e+00> : vector<8x256xf32>
    %126 = tpu.matmul %124, %125, %cst_48 {dimension_numbers = #tpu.dot_dimension_numbers<[1], [0], [0], [1], [0, 0, 1, 1], [], []>} : vector<8x64xbf16>, vector<64x256xbf16>, vector<8x256xf32> -> vector<8x256xf32>
    %127 = arith.addf %109, %126 : vector<8x256xf32>
    %128 = vector.extract_strided_slice %88 {offsets = [0, 128], sizes = [8, 64], strides = [1, 1]} : vector<8x256xf32> to vector<8x64xf32>
    %129 = vector.extract_strided_slice %89 {offsets = [0, 128], sizes = [8, 64], strides = [1, 1]} : vector<8x256xf32> to vector<8x64xf32>
    %130 = vector.extract_strided_slice %90 {offsets = [0, 128], sizes = [8, 64], strides = [1, 1]} : vector<8x256xf32> to vector<8x64xf32>
    "tpu.trace_start"() <{level = 10 : i32, message = "qd,kd->qk"}> : () -> ()
    %cst_49 = arith.constant dense<0.000000e+00> : vector<8x8xf32>
    %131 = tpu.matmul %128, %129, %cst_49 {dimension_numbers = #tpu.dot_dimension_numbers<[1], [1], [0], [0], [0, 0, 1, 0], [], []>} : vector<8x64xf32>, vector<8x64xf32>, vector<8x8xf32> -> vector<8x8xf32>
    "tpu.trace_stop"() : () -> ()
    %cst_50 = arith.constant dense<0xFF800000> : vector<8xf32>
    %132 = vector.multi_reduction <maximumf>, %131, %cst_50 [1] : vector<8x8xf32> to vector<8xf32>
    %133 = vector.shape_cast %132 : vector<8xf32> to vector<8x1xf32>
    %134 = vector.broadcast %133 : vector<8x1xf32> to vector<8x8xf32>
    %135 = arith.subf %131, %134 : vector<8x8xf32>
    %136 = math.exp %135 : vector<8x8xf32>
    %cst_51 = arith.constant dense<0.000000e+00> : vector<8xf32>
    %137 = vector.multi_reduction <add>, %136, %cst_51 [1] : vector<8x8xf32> to vector<8xf32>
    %138 = vector.shape_cast %137 : vector<8xf32> to vector<8x1xf32>
    %139 = vector.broadcast %138 : vector<8x1xf32> to vector<8x8xf32>
    %140 = arith.divf %136, %139 : vector<8x8xf32>
    %cst_52 = arith.constant dense<0.000000e+00> : vector<8x64xf32>
    %141 = tpu.matmul %140, %130, %cst_52 {dimension_numbers = #tpu.dot_dimension_numbers<[1], [0], [0], [1], [0, 0, 1, 1], [], []>} : vector<8x8xf32>, vector<8x64xf32>, vector<8x64xf32> -> vector<8x64xf32>
    %142 = arith.truncf %141 : vector<8x64xf32> to vector<8x64xbf16>
    %c128_53 = arith.constant 128 : index
    %c768_54 = arith.constant 768 : index
    %143 = vector.load %arg2[%c128_53, %c768_54] : memref<256x1024xbf16, #tpu.memory_space<vmem>>, vector<64x256xbf16>
    %cst_55 = arith.constant dense<0.000000e+00> : vector<8x256xf32>
    %144 = tpu.matmul %142, %143, %cst_55 {dimension_numbers = #tpu.dot_dimension_numbers<[1], [0], [0], [1], [0, 0, 1, 1], [], []>} : vector<8x64xbf16>, vector<64x256xbf16>, vector<8x256xf32> -> vector<8x256xf32>
    %145 = arith.addf %127, %144 : vector<8x256xf32>
    %146 = vector.extract_strided_slice %88 {offsets = [0, 192], sizes = [8, 64], strides = [1, 1]} : vector<8x256xf32> to vector<8x64xf32>
    %147 = vector.extract_strided_slice %89 {offsets = [0, 192], sizes = [8, 64], strides = [1, 1]} : vector<8x256xf32> to vector<8x64xf32>
    %148 = vector.extract_strided_slice %90 {offsets = [0, 192], sizes = [8, 64], strides = [1, 1]} : vector<8x256xf32> to vector<8x64xf32>
    "tpu.trace_start"() <{level = 10 : i32, message = "qd,kd->qk"}> : () -> ()
    %cst_56 = arith.constant dense<0.000000e+00> : vector<8x8xf32>
    %149 = tpu.matmul %146, %147, %cst_56 {dimension_numbers = #tpu.dot_dimension_numbers<[1], [1], [0], [0], [0, 0, 1, 0], [], []>} : vector<8x64xf32>, vector<8x64xf32>, vector<8x8xf32> -> vector<8x8xf32>
    "tpu.trace_stop"() : () -> ()
    %cst_57 = arith.constant dense<0xFF800000> : vector<8xf32>
    %150 = vector.multi_reduction <maximumf>, %149, %cst_57 [1] : vector<8x8xf32> to vector<8xf32>
    %151 = vector.shape_cast %150 : vector<8xf32> to vector<8x1xf32>
    %152 = vector.broadcast %151 : vector<8x1xf32> to vector<8x8xf32>
    %153 = arith.subf %149, %152 : vector<8x8xf32>
    %154 = math.exp %153 : vector<8x8xf32>
    %cst_58 = arith.constant dense<0.000000e+00> : vector<8xf32>
    %155 = vector.multi_reduction <add>, %154, %cst_58 [1] : vector<8x8xf32> to vector<8xf32>
    %156 = vector.shape_cast %155 : vector<8xf32> to vector<8x1xf32>
    %157 = vector.broadcast %156 : vector<8x1xf32> to vector<8x8xf32>
    %158 = arith.divf %154, %157 : vector<8x8xf32>
    %cst_59 = arith.constant dense<0.000000e+00> : vector<8x64xf32>
    %159 = tpu.matmul %158, %148, %cst_59 {dimension_numbers = #tpu.dot_dimension_numbers<[1], [0], [0], [1], [0, 0, 1, 1], [], []>} : vector<8x8xf32>, vector<8x64xf32>, vector<8x64xf32> -> vector<8x64xf32>
    %160 = arith.truncf %159 : vector<8x64xf32> to vector<8x64xbf16>
    %c192_60 = arith.constant 192 : index
    %c768_61 = arith.constant 768 : index
    %161 = vector.load %arg2[%c192_60, %c768_61] : memref<256x1024xbf16, #tpu.memory_space<vmem>>, vector<64x256xbf16>
    %cst_62 = arith.constant dense<0.000000e+00> : vector<8x256xf32>
    %162 = tpu.matmul %160, %161, %cst_62 {dimension_numbers = #tpu.dot_dimension_numbers<[1], [0], [0], [1], [0, 0, 1, 1], [], []>} : vector<8x64xbf16>, vector<64x256xbf16>, vector<8x256xf32> -> vector<8x256xf32>
    %163 = arith.addf %145, %162 : vector<8x256xf32>
    %164 = vector.broadcast %8 : vector<1x256xf32> to vector<8x256xf32>
    %165 = arith.addf %163, %164 : vector<8x256xf32>
    %c8 = arith.constant 8 : index
    %c0_63 = arith.constant 0 : index
    %166 = vector.load %arg4[%c8, %c0_63] : memref<16x256xf32, #tpu.memory_space<vmem>>, vector<8x256xf32>
    tpu.vector_store %arg4[%c8, %c0_63], %165 {strides = array<i32>} : memref<16x256xf32, #tpu.memory_space<vmem>>, vector<8x256xf32>,
    return
  }
  func.func @transform_0(%arg0: i32) -> (i32, i32) {
    %c0_i32 = arith.constant 0 : i32
    %c0_i32_0 = arith.constant 0 : i32
    %c0_i32_1 = arith.constant 0 : i32
    return %c0_i32, %c0_i32_0 : i32, i32
  }
  func.func @transform_1(%arg0: i32) -> (i32, i32) {
    %c0_i32 = arith.constant 0 : i32
    %c0_i32_0 = arith.constant 0 : i32
    %c0_i32_1 = arith.constant 0 : i32
    return %c0_i32, %c0_i32_0 : i32, i32
  }
  func.func @transform_2(%arg0: i32) -> (i32, i32) {
    %c0_i32 = arith.constant 0 : i32
    %c0_i32_0 = arith.constant 0 : i32
    %c0_i32_1 = arith.constant 0 : i32
    return %c0_i32, %c0_i32_0 : i32, i32
  }
  func.func @transform_3(%arg0: i32) -> (i32, i32) {
    %c0_i32 = arith.constant 0 : i32
    %c0_i32_0 = arith.constant 0 : i32
    %c0_i32_1 = arith.constant 0 : i32
    return %c0_i32, %c0_i32_0 : i32, i32
  }
}

</mosaic_0001>

<bundles_post_ra>
// kernel: historical_cross_attention.1
= control target key start
LH: loop header
LB: loop body
LE: loop exit
PB: predicated region body
PF: predicated region fallthrough
CT: control target
= control target key end

     0   :  { %8 = vsyncpa [#allocation3], 0  ;;  %s3413_s0 = inlined_call_operand.vmem [shape: bf16[32,256], index: 0, kind: input, shape index: {}]   ;;  %s3414_s1 = inlined_call_operand.hbm [shape: bf16[256,1024], index: 1, kind: input, shape index: {}]   ;;  %s3415_s2 = inlined_call_operand.vmem [shape: bf16[1,1024], index: 2, kind: input, shape index: {}]   ;;  %s3416_s3 = inlined_call_operand.hbm [shape: f32[16,256], index: 3, kind: output, shape index: {}]  }
   0x1   :  { %9 = vsyncpa [#allocation4], 0  ;;  %s16_s14 = sshll.u32 %s3414_s1, 4  ;;  %s3088_s15 = smov [#allocation2]   ;;  %s17_s14 = int_to_ptr.hbm [resolvable:$true] %s16_s14 }
   0x2   :  { %s18_s16 = sshll.u32 %s3088_s15, 4  ;;  %s3089_s17 = smov 512   ;;  %s19_s16 = int_to_ptr.vmem [resolvable:$true] %s18_s16 }
   0x3   :  { %s3090_s18 = smov 32  }
   0x4   :  { %24 = dma.hbm_to_vmem [thread:$0]  %s17_s14, 16384, %s19_s16, [#allocation3], %s3089_s17, %s3089_s17, %s3090_s18  }
   0x5   :  { %3084 = dma.done.wait [#allocation3], 16384  }
   0x6   :  { %3085 = vsyncadd [#allocation3], 4294950912  ;;  %v2323_v0 = vld [vmem:[#allocation2 + $0x1c0] sm:$0xf]  ;;  %v2331_v46 = vld [vmem:[#allocation2 + $0x1c8] sm:$0xf] }
   0x7   :  { %v2882_v1 = vld [vmem:[#allocation2 + $0x1dc] sm:$0xf0]  ;;  %v2883_v47 = vld [vmem:[#allocation2 + $0x1e4] sm:$0xf0]  ;;  %v2833_v54 = vld [vmem:[%s3413_s0 + $0x4] sm:$0xf] }
   0x8   :  { %v2515_v2 = vld [vmem:[#allocation2 + $0x3c0] sm:$0xf]  ;;  %v2324_v3 = vor.u32 %v2882_v1, %v2323_v0  ;;  %v2523_v48 = vld [vmem:[#allocation2 + $0x3c8] sm:$0xf]  ;;  %v2141_v55 = vld [vmem:[%s3413_s0 + $0x8] sm:$0xf0]  ;;  %v2332_v56 = vor.u32 %v2883_v47, %v2331_v46 }
   0x9   :  { %v2930_v4 = vld [vmem:[#allocation2 + $0x3dc] sm:$0xf0]  ;;  %v2931_v49 = vld [vmem:[#allocation2 + $0x3e4] sm:$0xf0]  ;;  %v3132_v63 = vor.u32 %v2833_v54, %v2141_v55  ;;  %v2884_v46 = vld [vmem:[#allocation2 + $0x1ec] sm:$0xf0] }
   0xa   :  { %v2299_v5 = vld [vmem:[#allocation2 + $0x180] sm:$0xf]  ;;  %v2516_v7 = vor.u32 %v2930_v4, %v2515_v2  ;;  %655 = vmatpush.bf16.msra.mxu0 %v2324_v3  ;;  %v2834_v52 = vld [vmem:[%s3413_s0 + $0x4] sm:$0xf0]  ;;  %v2524_v57 = vor.u32 %v2931_v49, %v2523_v48  ;;  %v2873_v47 = vld [vmem:[#allocation2 + $0x184] sm:$0xf] }
   0xb   :  { %v2876_v6 = vld [vmem:[#allocation2 + $0x19c] sm:$0xf0]  ;;  %v2307_v58 = vld [vmem:[#allocation2 + $0x188] sm:$0xf]  ;;  %v2301_v48 = vld [vmem:[#allocation2 + $0x1a0] sm:$0xf0] }
   0xc   :  { %v2491_v8 = vld [vmem:[#allocation2 + $0x380] sm:$0xf]  ;;  %v2300_v10 = vor.u32 %v2876_v6, %v2299_v5  ;;  %672 = vmatpush.bf16.msra.mxu1 %v2516_v7  ;;  %v2877_v59 = vld [vmem:[#allocation2 + $0x1a4] sm:$0xf0]  ;;  %v2531_v49 = vld [vmem:[#allocation2 + $0x3d0] sm:$0xf] }
   0xd   :  { %v2924_v9 = vld [vmem:[#allocation2 + $0x39c] sm:$0xf0]  ;;  %v2499_v61 = vld [vmem:[#allocation2 + $0x388] sm:$0xf]  ;;  %v2308_v0 = vor.u32 %v2877_v59, %v2307_v58  ;;  %v2867_v55 = vld [vmem:[#allocation2 + $0x144] sm:$0xf] }
   0xe   :  { %v2492_v11 = vor.u32 %v2924_v9, %v2491_v8  ;;  %v2275_v12 = vld [vmem:[#allocation2 + $0x140] sm:$0xf]  ;;  %656 = vmatpush.bf16.msra.mxu0 %v2300_v10  ;;  %v2925_v62 = vld [vmem:[#allocation2 + $0x3a4] sm:$0xf0]  ;;  %v2315_v58 = vld [vmem:[#allocation2 + $0x190] sm:$0xf] }
   0xf   :  { %v2870_v13 = vld [vmem:[#allocation2 + $0x15c] sm:$0xf0]  ;;  %v2500_v1 = vor.u32 %v2925_v62, %v2499_v61  ;;  %v2283_v2 = vld [vmem:[#allocation2 + $0x148] sm:$0xf]  ;;  %v2878_v59 = vld [vmem:[#allocation2 + $0x1ac] sm:$0xf0] }
  0x10   :  { %v2467_v14 = vld [vmem:[#allocation2 + $0x340] sm:$0xf]  ;;  %v2276_v16 = vor.u32 %v2870_v13, %v2275_v12  ;;  %673 = vmatpush.bf16.msra.mxu1 %v2492_v11  ;;  %v2871_v3 = vld [vmem:[#allocation2 + $0x164] sm:$0xf0]  ;;  %v2507_v61 = vld [vmem:[#allocation2 + $0x390] sm:$0xf] }
  0x11   :  { %v2918_v15 = vld [vmem:[#allocation2 + $0x35c] sm:$0xf0]  ;;  %v2475_v4 = vld [vmem:[#allocation2 + $0x348] sm:$0xf]  ;;  %v2284_v6 = vor.u32 %v2871_v3, %v2283_v2  ;;  %v2926_v62 = vld [vmem:[#allocation2 + $0x3ac] sm:$0xf0] }
  0x12   :  { %v2468_v17 = vor.u32 %v2918_v15, %v2467_v14  ;;  %v2251_v18 = vld [vmem:[#allocation2 + $0x100] sm:$0xf]  ;;  %657 = vmatpush.bf16.msra.mxu0 %v2276_v16  ;;  %v2919_v5 = vld [vmem:[#allocation2 + $0x364] sm:$0xf0]  ;;  %v2508_v2 = vor.u32 %v2926_v62, %v2507_v61  ;;  %v2291_v3 = vld [vmem:[#allocation2 + $0x150] sm:$0xf] }
  0x13   :  { %v2864_v19 = vld [vmem:[#allocation2 + $0x11c] sm:$0xf0]  ;;  %v2476_v7 = vor.u32 %v2919_v5, %v2475_v4  ;;  %v2259_v8 = vld [vmem:[#allocation2 + $0x108] sm:$0xf]  ;;  %v2872_v4 = vld [vmem:[#allocation2 + $0x16c] sm:$0xf0] }
  0x14   :  { %v2443_v20 = vld [vmem:[#allocation2 + $0x300] sm:$0xf]  ;;  %v2252_v22 = vor.u32 %v2864_v19, %v2251_v18  ;;  %674 = vmatpush.bf16.msra.mxu1 %v2468_v17  ;;  %v2865_v9 = vld [vmem:[#allocation2 + $0x124] sm:$0xf0]  ;;  %v2147_v18 = vld [vmem:[%s3413_s0 + $0x10] sm:$0xf] }
  0x15   :  { %v2912_v21 = vld [vmem:[#allocation2 + $0x31c] sm:$0xf0]  ;;  %v2451_v10 = vld [vmem:[#allocation2 + $0x308] sm:$0xf]  ;;  %v2260_v12 = vor.u32 %v2865_v9, %v2259_v8  ;;  %v2836_v19 = vld [vmem:[%s3413_s0 + $0x14] sm:$0xf0] }
  0x16   :  { %v2444_v23 = vor.u32 %v2912_v21, %v2443_v20  ;;  %v2227_v24 = vld [vmem:[#allocation2 + $0xc0] sm:$0xf]  ;;  %658 = vmatpush.bf16.msra.mxu0 %v2252_v22  ;;  %v2913_v11 = vld [vmem:[#allocation2 + $0x324] sm:$0xf0]  ;;  %v2835_v20 = vld [vmem:[%s3413_s0 + $0x14] sm:$0xf] }
  0x17   :  { %v2858_v25 = vld [vmem:[#allocation2 + $0xdc] sm:$0xf0]  ;;  %v2452_v13 = vor.u32 %v2913_v11, %v2451_v10  ;;  %v2235_v14 = vld [vmem:[#allocation2 + $0xc8] sm:$0xf]  ;;  %v2149_v21 = vld [vmem:[%s3413_s0 + $0x18] sm:$0xf0] }
  0x18   :  { %v2419_v26 = vld [vmem:[#allocation2 + $0x2c0] sm:$0xf]  ;;  %v2228_v28 = vor.u32 %v2858_v25, %v2227_v24  ;;  %675 = vmatpush.bf16.msra.mxu1 %v2444_v23  ;;  %v2859_v15 = vld [vmem:[#allocation2 + $0xe4] sm:$0xf0]  ;;  %v2483_v5 = vld [vmem:[#allocation2 + $0x350] sm:$0xf] }
  0x19   :  { %v2906_v27 = vld [vmem:[#allocation2 + $0x2dc] sm:$0xf0]  ;;  %v2427_v16 = vld [vmem:[#allocation2 + $0x2c8] sm:$0xf]  ;;  %v2236_v22 = vor.u32 %v2859_v15, %v2235_v14  ;;  %v2267_v8 = vld [vmem:[#allocation2 + $0x110] sm:$0xf] }
  0x1a   :  { %v2420_v29 = vor.u32 %v2906_v27, %v2419_v26  ;;  %v2203_v30 = vld [vmem:[#allocation2 + $0x80] sm:$0xf]  ;;  %659 = vmatpush.bf16.msra.mxu0 %v2228_v28  ;;  %v2907_v17 = vld [vmem:[#allocation2 + $0x2e4] sm:$0xf0]  ;;  %v3148_v26 = vor.u32 %v2836_v19, %v2147_v18  ;;  %v2866_v9 = vld [vmem:[#allocation2 + $0x12c] sm:$0xf0] }
  0x1b   :  { %v2852_v31 = vld [vmem:[#allocation2 + $0x9c] sm:$0xf0]  ;;  %v2428_v23 = vor.u32 %v2907_v17, %v2427_v16  ;;  %v2211_v24 = vld [vmem:[#allocation2 + $0x88] sm:$0xf]  ;;  %v2459_v11 = vld [vmem:[#allocation2 + $0x310] sm:$0xf]  ;;  %v2268_v18 = vor.u32 %v2866_v9, %v2267_v8 }
  0x1c   :  { %v2395_v32 = vld [vmem:[#allocation2 + $0x280] sm:$0xf]  ;;  %v2204_v34 = vor.u32 %v2852_v31, %v2203_v30  ;;  %676 = vmatpush.bf16.msra.mxu1 %v2420_v29  ;;  %v2853_v25 = vld [vmem:[#allocation2 + $0xa4] sm:$0xf0]  ;;  %v3150_v29 = vor.u32 %v2835_v20, %v2149_v21  ;;  %v2914_v14 = vld [vmem:[#allocation2 + $0x32c] sm:$0xf0] }
  0x1d   :  { %v2900_v33 = vld [vmem:[#allocation2 + $0x29c] sm:$0xf0]  ;;  %v2403_v27 = vld [vmem:[#allocation2 + $0x288] sm:$0xf]  ;;  %v2212_v30 = vor.u32 %v2853_v25, %v2211_v24  ;;  %v2855_v16 = vld [vmem:[#allocation2 + $0xc4] sm:$0xf]  ;;  %v2460_v21 = vor.u32 %v2914_v14, %v2459_v11 }
  0x1e   :  { %v2396_v35 = vor.u32 %v2900_v33, %v2395_v32  ;;  %v2179_v36 = vld [vmem:[#allocation2 + $0x40] sm:$0xf]  ;;  %660 = vmatpush.bf16.msra.mxu0 %v2204_v34  ;;  %v2901_v28 = vld [vmem:[#allocation2 + $0x2a4] sm:$0xf0]  ;;  %v2229_v17 = vld [vmem:[#allocation2 + $0xe0] sm:$0xf0] }
  0x1f   :  { %v2846_v37 = vld [vmem:[#allocation2 + $0x5c] sm:$0xf0]  ;;  %v2404_v31 = vor.u32 %v2901_v28, %v2403_v27  ;;  %v2187_v32 = vld [vmem:[#allocation2 + $0x48] sm:$0xf]  ;;  %v2243_v19 = vld [vmem:[#allocation2 + $0xd0] sm:$0xf]  ;;  %v2232_v20 = vor.u32 %v2855_v16, %v2229_v17 }
  0x20   :  { %v2371_v38 = vld [vmem:[#allocation2 + $0x240] sm:$0xf]  ;;  %v2180_v40 = vor.u32 %v2846_v37, %v2179_v36  ;;  %677 = vmatpush.bf16.msra.mxu1 %v2396_v35  ;;  %v2847_v33 = vld [vmem:[#allocation2 + $0x64] sm:$0xf0]  ;;  %v2205_v24 = vld [vmem:[#allocation2 + $0xa0] sm:$0xf0] }
  0x21   :  { %v2894_v39 = vld [vmem:[#allocation2 + $0x25c] sm:$0xf0]  ;;  %v2379_v34 = vld [vmem:[#allocation2 + $0x248] sm:$0xf]  ;;  %v2188_v37 = vor.u32 %v2847_v33, %v2187_v32  ;;  %v2435_v25 = vld [vmem:[#allocation2 + $0x2d0] sm:$0xf] }
  0x22   :  { %v2372_v41 = vor.u32 %v2894_v39, %v2371_v38  ;;  %v2155_v42 = vld [vmem:[#allocation2] sm:$0xf]  ;;  %661 = vmatpush.bf16.msra.mxu0 %v2180_v40  ;;  %v2895_v35 = vld [vmem:[#allocation2 + $0x264] sm:$0xf0]  ;;  %v2879_v39 = vld [vmem:[#allocation2 + $0x1c4] sm:$0xf] }
  0x23   :  { %v2840_v43 = vld [vmem:[#allocation2 + $0x1c] sm:$0xf0]  ;;  %v2163_v36 = vld [vmem:[#allocation2 + $0x8] sm:$0xf]  ;;  %v2325_v40 = vld [vmem:[#allocation2 + $0x1e0] sm:$0xf0] }
  0x24   :  { %v2347_v44 = vld [vmem:[#allocation2 + $0x200] sm:$0xf]  ;;  %v2156_v50 = vor.u32 %v2840_v43, %v2155_v42  ;;  %678 = vmatpush.bf16.msra.mxu1 %v2372_v41  ;;  %v2841_v38 = vld [vmem:[#allocation2 + $0x24] sm:$0xf0]  ;;  %v2380_v41 = vor.u32 %v2895_v35, %v2379_v34  ;;  %v2908_v27 = vld [vmem:[#allocation2 + $0x2ec] sm:$0xf0] }
  0x25   :  { %v2888_v45 = vld [vmem:[#allocation2 + $0x21c] sm:$0xf0]  ;;  %v2355_v42 = vld [vmem:[#allocation2 + $0x208] sm:$0xf]  ;;  %v2436_v32 = vor.u32 %v2908_v27, %v2435_v25  ;;  %v2854_v33 = vld [vmem:[#allocation2 + $0xac] sm:$0xf0] }
  0x26   :  { %v2139_v51 = vld [vmem:[%s3413_s0] sm:$0xf]  ;;  %v2348_v53 = vor.u32 %v2888_v45, %v2347_v44  ;;  %662 = vmatpush.bf16.msra.mxu0 %v2156_v50  ;;  %v2889_v43 = vld [vmem:[#allocation2 + $0x224] sm:$0xf0]  ;;  %v2339_v44 = vld [vmem:[#allocation2 + $0x1d0] sm:$0xf]  ;;  %v2328_v45 = vor.u32 %v2879_v39, %v2325_v40 }
  0x27   :  { %v3130_v60 = vor.u32 %v2834_v52, %v2139_v51  ;;  %v2932_v50 = vld [vmem:[#allocation2 + $0x3ec] sm:$0xf0]  ;;  %v2304_v51 = vor.u32 %v2873_v47, %v2301_v48  ;;  %v2164_v52 = vor.u32 %v2841_v38, %v2163_v36  ;;  %v2340_v54 = vor.u32 %v2884_v46, %v2339_v44  ;;  %v2843_v34 = vld [vmem:[#allocation2 + $0x44] sm:$0xf]  ;;  %v2850_v9 = vld [vmem:[#allocation2 + $0x8c] sm:$0xf] }
  0x28   :  { %679 = vmatpush.bf16.msra.mxu1 %v2348_v53  ;;  %689 = vmatpush.bf16.msra.mxu2 %v2328_v45  ;;  %v2356_v53 = vor.u32 %v2889_v43, %v2355_v42  ;;  %v2181_v35 = vld [vmem:[#allocation2 + $0x60] sm:$0xf0]  ;;  %v2411_v36 = vld [vmem:[#allocation2 + $0x290] sm:$0xf]  ;;  %v2165_v16 = vld [vmem:[#allocation2 + $0x28] sm:$0xf0] }
  0x29   :  { %663 = vmatmul.bf16.vlgmr.msra.gmra.mxu0 %v3130_v60  ;;  %v2184_v39 = vor.u32 %v2843_v34, %v2181_v35  ;;  %v2848_v42 = vld [vmem:[#allocation2 + $0x6c] sm:$0xf0]  ;;  %v2881_v17 = vld [vmem:[#allocation2 + $0x1d4] sm:$0xf]  ;;  %vm861_vm0 = vcmask 523264   ;;  %s3091_s8 = smov 64  }
  0x2a   :  { %723 = vmatpush.bf16.msrb.mxu0 %v2332_v56  ;;  %v2277_v56 = vld [vmem:[#allocation2 + $0x160] sm:$0xf0]  ;;  %v2387_v43 = vld [vmem:[#allocation2 + $0x250] sm:$0xf]  ;;  %v2293_v25 = vld [vmem:[#allocation2 + $0x170] sm:$0xf0] }
  0x2b   :  { %680 = vmatmul.bf16.vlgmr.msra.gmra.mxu1 %v3132_v63  ;;  %v2896_v44 = vld [vmem:[#allocation2 + $0x26c] sm:$0xf0]  ;;  %v2851_v35 = vld [vmem:[#allocation2 + $0x94] sm:$0xf]  ;;  %vm888_vm1 = vcmask 64512   ;;  %s2124_s14 = sshll.u32 %s3416_s3, 4  ;;  %s2125_s14 = int_to_ptr.hbm [resolvable:$true] %s2124_s14 }
  0x2c   :  { %740 = vmatpush.bf16.msrb.mxu1 %v2524_v57  ;;  %v2532_v57 = vor.u32 %v2932_v50, %v2531_v49  ;;  %690 = vmatpush.bf16.msra.mxu2 %v2304_v51  ;;  %v2171_v46 = vld [vmem:[#allocation2 + $0x10] sm:$0xf]  ;;  %v2388_v49 = vor.u32 %v2896_v44, %v2387_v43  ;;  %v2837_v51 = vld [vmem:[#allocation2 + $0x4] sm:$0xf]  ;;  %s3093_s15 = smov 256   ;;  %s3094_s16 = smov 16  }
  0x2d   :  { %v2842_v47 = vld [vmem:[#allocation2 + $0x2c] sm:$0xf0]  ;;  %v3170_v44 = vld [vmem:[%s3415_s2] sm:$0x3f] }
  0x2e   :  { %724 = vmatpush.bf16.msrb.mxu0 %v2308_v0  ;;  %v2280_v0 = vor.u32 %v2867_v55, %v2277_v56  ;;  %v2363_v48 = vld [vmem:[#allocation2 + $0x210] sm:$0xf]  ;;  %v2333_v55 = vld [vmem:[#allocation2 + $0x1e8] sm:$0xf0] }
  0x2f   :  { %v2890_v50 = vld [vmem:[#allocation2 + $0x22c] sm:$0xf0]  ;;  %v2874_v56 = vld [vmem:[#allocation2 + $0x18c] sm:$0xf] }
  0x30   :  { %741 = vmatpush.bf16.msrb.mxu1 %v2500_v1  ;;  %v2316_v1 = vor.u32 %v2878_v59, %v2315_v58  ;;  %691 = vmatpush.bf16.msra.mxu2 %v2280_v0  ;;  %v2309_v58 = vld [vmem:[#allocation2 + $0x1a8] sm:$0xf0]  ;;  %v2172_v59 = vor.u32 %v2842_v47, %v2171_v46  ;;  %v2364_v61 = vor.u32 %v2890_v50, %v2363_v48  ;;  %v2927_v48 = vld [vmem:[#allocation2 + $0x3c4] sm:$0xf] }
  0x31   :  { %v2312_v62 = vor.u32 %v2874_v56, %v2309_v58  ;;  %v2868_v0 = vld [vmem:[#allocation2 + $0x14c] sm:$0xf]  ;;  %v2921_v50 = vld [vmem:[#allocation2 + $0x384] sm:$0xf] }
  0x32   :  { %725 = vmatpush.bf16.msrb.mxu0 %v2284_v6  ;;  %v2920_v6 = vld [vmem:[#allocation2 + $0x36c] sm:$0xf0]  ;;  %v2915_v58 = vld [vmem:[#allocation2 + $0x344] sm:$0xf] }
  0x33   :  { %v2484_v10 = vor.u32 %v2920_v6, %v2483_v5  ;;  %v2856_v6 = vld [vmem:[#allocation2 + $0xcc] sm:$0xf] }
  0x34   :  { %742 = vmatpush.bf16.msrb.mxu1 %v2476_v7  ;;  %v2292_v7 = vor.u32 %v2872_v4, %v2291_v3  ;;  %v2862_v3 = vld [vmem:[#allocation2 + $0x10c] sm:$0xf] }
  0x35   :  { %v2261_v4 = vld [vmem:[#allocation2 + $0x128] sm:$0xf0] }
  0x36   :  { %726 = vmatpush.bf16.msrb.mxu0 %v2260_v12  ;;  %v2861_v12 = vld [vmem:[#allocation2 + $0x104] sm:$0xf]  ;;  %v2264_v5 = vor.u32 %v2862_v3, %v2261_v4 }
  0x38   :  { %743 = vmatpush.bf16.msrb.mxu1 %v2452_v13  ;;  %v2253_v13 = vld [vmem:[#allocation2 + $0x120] sm:$0xf0] }
  0x39   :  { %668 = vmatmul.bf16.gmra.mxu0 %v3148_v26  ;;  %v2256_v15 = vor.u32 %v2861_v12, %v2253_v13  ;;  %v2844_v12 = vld [vmem:[#allocation2 + $0x4c] sm:$0xf] }
  0x3a   :  { %727 = vmatpush.bf16.msrb.mxu0 %v2236_v22  ;;  %v2860_v22 = vld [vmem:[#allocation2 + $0xec] sm:$0xf0]  ;;  %v2189_v13 = vld [vmem:[#allocation2 + $0x68] sm:$0xf0] }
  0x3b   :  { %685 = vmatmul.bf16.gmra.mxu1 %v3150_v29  ;;  %692 = vmatpush.bf16.msra.mxu2 %v2256_v15  ;;  %v2244_v28 = vor.u32 %v2860_v22, %v2243_v19  ;;  %v2192_v14 = vor.u32 %v2844_v12, %v2189_v13  ;;  %v2838_v15 = vld [vmem:[#allocation2 + $0xc] sm:$0xf]  ;;  %v2317_v22 = vld [vmem:[#allocation2 + $0x1b0] sm:$0xf0]  ;;  %v2891_v12 = vld [vmem:[#allocation2 + $0x244] sm:$0xf] }
  0x3c   :  { %744 = vmatpush.bf16.msrb.mxu1 %v2428_v23  ;;  %v2849_v23 = vld [vmem:[#allocation2 + $0x84] sm:$0xf]  ;;  %v2168_v19 = vor.u32 %v2838_v15, %v2165_v16 }
  0x3d   :  { %v2373_v13 = vld [vmem:[#allocation2 + $0x260] sm:$0xf0] }
  0x3e   :  { %728 = vmatpush.bf16.msrb.mxu0 %v2212_v30  ;;  %v2219_v30 = vld [vmem:[#allocation2 + $0x90] sm:$0xf]  ;;  %v2885_v15 = vld [vmem:[#allocation2 + $0x204] sm:$0xf] }
  0x3f   :  { %693 = vmatpush.bf16.msra.mxu2 %v2232_v20  ;;  %v2220_v38 = vor.u32 %v2854_v33, %v2219_v30  ;;  %v2269_v30 = vld [vmem:[#allocation2 + $0x130] sm:$0xf0]  ;;  %v2349_v16 = vld [vmem:[#allocation2 + $0x220] sm:$0xf0] }
  0x40   :  { %745 = vmatpush.bf16.msrb.mxu1 %v2404_v31  ;;  %v2208_v31 = vor.u32 %v2849_v23, %v2205_v24  ;;  %v2869_v24 = vld [vmem:[#allocation2 + $0x154] sm:$0xf] }
  0x41   :  { %v2296_v27 = vor.u32 %v2869_v24, %v2293_v25  ;;  %v2245_v33 = vld [vmem:[#allocation2 + $0xf0] sm:$0xf0]  ;;  %v2501_v24 = vld [vmem:[#allocation2 + $0x3a8] sm:$0xf0] }
  0x42   :  { %729 = vmatpush.bf16.msrb.mxu0 %v2188_v37  ;;  %v2902_v37 = vld [vmem:[#allocation2 + $0x2ac] sm:$0xf0] }
  0x43   :  { %694 = vmatpush.bf16.msra.mxu2 %v2208_v31  ;;  %v2412_v40 = vor.u32 %v2902_v37, %v2411_v36  ;;  %v2221_v36 = vld [vmem:[#allocation2 + $0xb0] sm:$0xf0] }
  0x44   :  { %746 = vmatpush.bf16.msrb.mxu1 %v2380_v41  ;;  %v2195_v41 = vld [vmem:[#allocation2 + $0x50] sm:$0xf]  ;;  %v2224_v37 = vor.u32 %v2851_v35, %v2221_v36  ;;  %v2453_v35 = vld [vmem:[#allocation2 + $0x328] sm:$0xf0] }
  0x45   :  { %v2196_v45 = vor.u32 %v2848_v42, %v2195_v41  ;;  %v2839_v41 = vld [vmem:[#allocation2 + $0x14] sm:$0xf] }
  0x46   :  { %730 = vmatpush.bf16.msrb.mxu0 %v2164_v52  ;;  %v2157_v52 = vld [vmem:[#allocation2 + $0x20] sm:$0xf0]  ;;  %v2173_v42 = vld [vmem:[#allocation2 + $0x30] sm:$0xf0] }
  0x47   :  { %695 = vmatpush.bf16.msra.mxu2 %v2184_v39  ;;  %v2197_v39 = vld [vmem:[#allocation2 + $0x70] sm:$0xf0]  ;;  %v2176_v43 = vor.u32 %v2839_v41, %v2173_v42  ;;  %v2904_v41 = vld [vmem:[#allocation2 + $0x2cc] sm:$0xf] }
  0x48   :  { %747 = vmatpush.bf16.msrb.mxu1 %v2356_v53  ;;  %v2160_v53 = vor.u32 %v2837_v51, %v2157_v52  ;;  %v2493_v52 = vld [vmem:[#allocation2 + $0x3a0] sm:$0xf0]  ;;  %v2429_v42 = vld [vmem:[#allocation2 + $0x2e8] sm:$0xf0] }
  0x49   :  { %731 = vmatmul.bf16.vlgmr.msrb.gmra.mxu0 %v3130_v60 }
  0x4a   :  { %791 = vmatpush.bf16.msra.mxu0 %v2340_v54  ;;  %v2880_v54 = vld [vmem:[#allocation2 + $0x1cc] sm:$0xf] }
  0x4b   :  { %748 = vmatmul.bf16.vlgmr.msrb.gmra.mxu1 %v3132_v63  ;;  %696 = vmatpush.bf16.msra.mxu2 %v2160_v53 }
  0x4c   :  { %808 = vmatpush.bf16.msra.mxu1 %v2532_v57  ;;  %v2336_v57 = vor.u32 %v2880_v54, %v2333_v55 }
  0x4e   :  { %792 = vmatpush.bf16.msra.mxu0 %v2316_v1  ;;  %v2285_v1 = vld [vmem:[#allocation2 + $0x168] sm:$0xf0]  ;;  %697 = vmatmul.bf16.vlgmr.msra.gmra.mxu2 %v3130_v60 }
  0x4f   :  { %757 = vmatpush.bf16.msrb.mxu2 %v2336_v57 }
  0x50   :  { %809 = vmatpush.bf16.msra.mxu1 %v2508_v2  ;;  %v2288_v2 = vor.u32 %v2868_v0, %v2285_v1  ;;  %v2445_v0 = vld [vmem:[#allocation2 + $0x320] sm:$0xf0] }
  0x52   :  { %793 = vmatpush.bf16.msra.mxu0 %v2292_v7  ;;  %v2237_v7 = vld [vmem:[#allocation2 + $0xe8] sm:$0xf0] }
  0x53   :  { %758 = vmatpush.bf16.msrb.mxu2 %v2312_v62  ;;  %v2240_v8 = vor.u32 %v2856_v6, %v2237_v7  ;;  %v2421_v6 = vld [vmem:[#allocation2 + $0x2e0] sm:$0xf0] }
  0x54   :  { %810 = vmatpush.bf16.msra.mxu1 %v2484_v10  ;;  %v2213_v10 = vld [vmem:[#allocation2 + $0xa8] sm:$0xf0] }
  0x55   :  { %v2216_v11 = vor.u32 %v2850_v9, %v2213_v10  ;;  %v2397_v9 = vld [vmem:[#allocation2 + $0x2a0] sm:$0xf0] }
  0x56   :  { %794 = vmatpush.bf16.msra.mxu0 %v2268_v18  ;;  %v2341_v18 = vld [vmem:[#allocation2 + $0x1f0] sm:$0xf0] }
  0x57   :  { %759 = vmatpush.bf16.msrb.mxu2 %v2288_v2  ;;  %v2344_v20 = vor.u32 %v2881_v17, %v2341_v18  ;;  %v2352_v17 = vor.u32 %v2885_v15, %v2349_v16 }
  0x58   :  { %811 = vmatpush.bf16.msra.mxu1 %v2460_v21  ;;  %v2875_v21 = vld [vmem:[#allocation2 + $0x194] sm:$0xf] }
  0x59   :  { %734 = vmatmul.bf16.gmra.mxu0 %v3148_v26  ;;  %v2320_v23 = vor.u32 %v2875_v21, %v2317_v22  ;;  %v2525_v21 = vld [vmem:[#allocation2 + $0x3e8] sm:$0xf0] }
  0x5a   :  { %795 = vmatpush.bf16.msra.mxu0 %v2244_v28  ;;  %v2863_v28 = vld [vmem:[#allocation2 + $0x114] sm:$0xf]  ;;  %v2922_v22 = vld [vmem:[#allocation2 + $0x38c] sm:$0xf] }
  0x5b   :  { %751 = vmatmul.bf16.gmra.mxu1 %v3150_v29  ;;  %760 = vmatpush.bf16.msrb.mxu2 %v2264_v5  ;;  %v2272_v31 = vor.u32 %v2863_v28, %v2269_v30  ;;  %v2903_v5 = vld [vmem:[#allocation2 + $0x2c4] sm:$0xf]  ;;  %v2504_v25 = vor.u32 %v2922_v22, %v2501_v24  ;;  %v2437_v22 = vld [vmem:[#allocation2 + $0x2f0] sm:$0xf0] }
  0x5c   :  { %812 = vmatpush.bf16.msra.mxu1 %v2436_v32  ;;  %v2857_v32 = vld [vmem:[#allocation2 + $0xd4] sm:$0xf]  ;;  %v2424_v7 = vor.u32 %v2903_v5, %v2421_v6 }
  0x5d   :  { %v2248_v34 = vor.u32 %v2857_v32, %v2245_v33  ;;  %v2477_v32 = vld [vmem:[#allocation2 + $0x368] sm:$0xf0] }
  0x5e   :  { %796 = vmatpush.bf16.msra.mxu0 %v2220_v38  ;;  %702 = vmatmul.bf16.gmra.mxu2 %v3148_v26  ;;  %v2845_v38 = vld [vmem:[#allocation2 + $0x54] sm:$0xf]  ;;  %v2910_v33 = vld [vmem:[#allocation2 + $0x30c] sm:$0xf] }
  0x5f   :  { %761 = vmatpush.bf16.msrb.mxu2 %v2240_v8  ;;  %v2897_v8 = vld [vmem:[#allocation2 + $0x284] sm:$0xf]  ;;  %v2456_v36 = vor.u32 %v2910_v33, %v2453_v35  ;;  %v2389_v35 = vld [vmem:[#allocation2 + $0x270] sm:$0xf0] }
  0x60   :  { %813 = vmatpush.bf16.msra.mxu1 %v2412_v40  ;;  %v2200_v40 = vor.u32 %v2845_v38, %v2197_v39  ;;  %v2400_v10 = vor.u32 %v2897_v8, %v2397_v9  ;;  %v2923_v9 = vld [vmem:[#allocation2 + $0x394] sm:$0xf] }
  0x62   :  { %797 = vmatpush.bf16.msra.mxu0 %v2196_v45  ;;  %v3173_v45 = vunpack.c.l.bf16 %v3170_v44 }
  0x63   :  { %762 = vmatpush.bf16.msrb.mxu2 %v2216_v11 }
  0x64   :  { %814 = vmatpush.bf16.msra.mxu1 %v2388_v49  ;;  %v2517_v49 = vld [vmem:[#allocation2 + $0x3e0] sm:$0xf0]  ;;  %v137_v53 = vperm.slane %v3173_v45, 0  ;;  %v139_v28 = vperm.slane %v3173_v45, 4 }
  0x65   :  { %v2520_v51 = vor.u32 %v2927_v48, %v2517_v49  ;;  %v2432_v48 = vor.u32 %v2904_v41, %v2429_v42 }
  0x66   :  { %798 = vmatpush.bf16.msra.mxu0 %v2172_v59  ;;  %v3180_v54 = vperm.slane %v137_v53, 0  ;;  %v2469_v59 = vld [vmem:[#allocation2 + $0x360] sm:$0xf0] }
  0x67   :  { %763 = vmatpush.bf16.msrb.mxu2 %v2192_v14  ;;  %706 = vmatpush.bf16.msra.mxu3 %v2520_v51  ;;  %v2472_v62 = vor.u32 %v2915_v58, %v2469_v59  ;;  %v2376_v14 = vor.u32 %v2891_v12, %v2373_v13  ;;  %v2405_v51 = vld [vmem:[#allocation2 + $0x2a8] sm:$0xf0]  ;;  %v2485_v12 = vld [vmem:[#allocation2 + $0x370] sm:$0xf0] }
  0x68   :  { %815 = vmatpush.bf16.msra.mxu1 %v2364_v61  ;;  %v2909_v61 = vld [vmem:[#allocation2 + $0x304] sm:$0xf]  ;;  %v2886_v59 = vld [vmem:[#allocation2 + $0x20c] sm:$0xf] }
  0x69   :  { %799 = vmatmul.bf16.vlgmr.msra.gmra.mxu0 %v3130_v60  ;;  %v2448_v2 = vor.u32 %v2909_v61, %v2445_v0  ;;  %v2357_v61 = vld [vmem:[#allocation2 + $0x228] sm:$0xf0]  ;;  %v2533_v0 = vld [vmem:[#allocation2 + $0x3f0] sm:$0xf0] }
  0x6b   :  { %816 = vmatmul.bf16.vlgmr.msra.gmra.mxu1 %v3132_v63  ;;  %764 = vmatpush.bf16.msrb.mxu2 %v2168_v19 }
  0x6e   :  { %765 = vmatmul.bf16.vlgmr.msrb.gmra.mxu2 %v3130_v60 }
  0x6f   :  { %825 = vmatpush.bf16.msra.mxu2 %v2344_v20  ;;  %v2928_v20 = vld [vmem:[#allocation2 + $0x3cc] sm:$0xf] }
  0x73   :  { %826 = vmatpush.bf16.msra.mxu2 %v2320_v23  ;;  %v2528_v23 = vor.u32 %v2928_v20, %v2525_v21  ;;  %v2905_v21 = vld [vmem:[#allocation2 + $0x2d4] sm:$0xf] }
  0x74   :  { %v2440_v24 = vor.u32 %v2905_v21, %v2437_v22 }
  0x77   :  { %827 = vmatpush.bf16.msra.mxu2 %v2296_v27 }
  0x79   :  { %802 = vmatmul.bf16.gmra.mxu0 %v3148_v26 }
  0x7b   :  { %819 = vmatmul.bf16.gmra.mxu1 %v3150_v29  ;;  %828 = vmatpush.bf16.msra.mxu2 %v2272_v31  ;;  %v2916_v31 = vld [vmem:[#allocation2 + $0x34c] sm:$0xf] }
  0x7e   :  { %768 = vmatmul.bf16.gmra.mxu2 %v3148_v26 }
  0x7f   :  { %829 = vmatpush.bf16.msra.mxu2 %v2248_v34  ;;  %v2480_v34 = vor.u32 %v2916_v31, %v2477_v32 }
  0x83   :  { %830 = vmatpush.bf16.msra.mxu2 %v2224_v37  ;;  %v3188_v37 = vperm.slane %v139_v28, 0  ;;  %v2899_v28 = vld [vmem:[#allocation2 + $0x294] sm:$0xf] }
  0x87   :  { %831 = vmatpush.bf16.msra.mxu2 %v2200_v40 }
  0x8b   :  { %832 = vmatpush.bf16.msra.mxu2 %v2176_v43 }
  0x8e   :  { %833 = vmatmul.bf16.vlgmr.msra.gmra.mxu2 %v3130_v60  ;;  %v2496_v60 = vor.u32 %v2921_v50, %v2493_v52  ;;  %v2898_v50 = vld [vmem:[#allocation2 + $0x28c] sm:$0xf] }
  0x8f   :  { %v2408_v53 = vor.u32 %v2898_v50, %v2405_v51 }
  0x90   :  { %707 = vmatpush.bf16.msra.mxu3 %v2496_v60  ;;  %v2892_v60 = vld [vmem:[#allocation2 + $0x24c] sm:$0xf] }
  0x94   :  { %708 = vmatpush.bf16.msra.mxu3 %v2472_v62  ;;  %v2929_v62 = vld [vmem:[#allocation2 + $0x3d4] sm:$0xf] }
  0x98   :  { %709 = vmatpush.bf16.msra.mxu3 %v2448_v2  ;;  %v2536_v2 = vor.u32 %v2929_v62, %v2533_v0 }
  0x9c   :  { %710 = vmatpush.bf16.msra.mxu3 %v2424_v7  ;;  %v134_v7 = vunpack.c.h.bf16 %v3170_v44 }
  0x9e   :  { %836 = vmatmul.bf16.gmra.mxu2 %v3148_v26  ;;  %v3209_v16 = vperm.slane %v134_v7, 0 }
  0xa0   :  { %711 = vmatpush.bf16.msra.mxu3 %v2400_v10  ;;  %v2509_v10 = vld [vmem:[#allocation2 + $0x3b0] sm:$0xf0]  ;;  %v153_v44 = vperm.slane %v3209_v16, 0 }
  0xa4   :  { %712 = vmatpush.bf16.msra.mxu3 %v2376_v14 }
  0xa6   :  { %v3175_v46 = vpop.f32.mrf.mxu0 }
  0xa7   :  { %v665_v43 = vadd.f32 %v3175_v46, %v3180_v54 }
  0xa8   :  { %v3177_v47 = vpop.f32.mrf.mxu1  ;;  %713 = vmatpush.bf16.msra.mxu3 %v2352_v17  ;;  %v2911_v17 = vld [vmem:[#allocation2 + $0x314] sm:$0xf] }
  0xa9   :  { %v682_v52 = vadd.f32 %v3177_v47, %v665_v43  ;;  %v2360_v47 = vor.u32 %v2886_v59, %v2357_v61 }
  0xab   :  { %714 = vmatmul.bf16.vlgmr.msra.gmra.mxu3 %v3132_v63 }
  0xac   :  { %774 = vmatpush.bf16.msrb.mxu3 %v2528_v23 }
  0xae   :  { %v666_v55 = vpop.f32.mrf.mxu0 }
  0xaf   :  { %v667_v56 = vadd.f32 %v666_v55, %v3180_v54  ;;  %v2381_v55 = vld [vmem:[#allocation2 + $0x268] sm:$0xf0] }
  0xb0   :  { %v683_v57 = vpop.f32.mrf.mxu1  ;;  %775 = vmatpush.bf16.msrb.mxu3 %v2504_v25  ;;  %v2384_v46 = vor.u32 %v2892_v60, %v2381_v55 }
  0xb1   :  { %v3184_v1 = vadd.f32 %v683_v57, %v667_v56  ;;  %v138_v57 = vperm.slane %v3173_v45, 2 }
  0xb3   :  { %v3202_v5 = vperm.slane %v138_v57, 0 }
  0xb4   :  { %776 = vmatpush.bf16.msrb.mxu3 %v2480_v34  ;;  %v2893_v34 = vld [vmem:[#allocation2 + $0x254] sm:$0xf] }
  0xb6   :  { %v669_v3 = vpop.f32.mrf.mxu0 }
  0xb8   :  { %v686_v4 = vpop.f32.mrf.mxu1  ;;  %777 = vmatpush.bf16.msrb.mxu3 %v2456_v36 }
  0xbb   :  { %719 = vmatmul.bf16.gmra.mxu3 %v3150_v29 }
  0xbc   :  { %778 = vmatpush.bf16.msrb.mxu3 %v2432_v48 }
  0xbe   :  { %v670_v26 = vpop.f32.mrf.mxu0 }
  0xbf   :  { %v2917_v26 = vld [vmem:[#allocation2 + $0x354] sm:$0xf] }
  0xc0   :  { %v687_v11 = vpop.f32.mrf.mxu1  ;;  %779 = vmatpush.bf16.msrb.mxu3 %v2408_v53  ;;  %v2488_v14 = vor.u32 %v2917_v26, %v2485_v12  ;;  %v2545_v12 = vld [vmem:[#allocation2 + $0x118] sm:$0xf] }
  0xc1   :  { %v2512_v11 = vor.u32 %v2923_v9, %v2509_v10  ;;  %v2553_v9 = vld [vmem:[#allocation2 + $0x158] sm:$0xf] }
  0xc2   :  { %v2944_v10 = vld [vmem:[#allocation2 + $0x174] sm:$0xf0] }
  0xc4   :  { %780 = vmatpush.bf16.msrb.mxu3 %v2384_v46 }
  0xc6   :  { %v732_v18 = vpop.f32.mrf.mxu0 }
  0xc7   :  { %v2461_v18 = vld [vmem:[#allocation2 + $0x330] sm:$0xf0] }
  0xc8   :  { %v749_v19 = vpop.f32.mrf.mxu1  ;;  %781 = vmatpush.bf16.msrb.mxu3 %v2360_v47  ;;  %v2464_v20 = vor.u32 %v2911_v17, %v2461_v18 }
  0xcb   :  { %782 = vmatmul.bf16.vlgmr.msrb.gmra.mxu3 %v3132_v63 }
  0xcc   :  { %842 = vmatpush.bf16.msra.mxu3 %v2536_v2  ;;  %v2569_v2 = vld [vmem:[#allocation2 + $0x1d8] sm:$0xf] }
  0xce   :  { %v733_v27 = vpop.f32.mrf.mxu0 }
  0xd0   :  { %v750_v30 = vpop.f32.mrf.mxu1  ;;  %843 = vmatpush.bf16.msra.mxu3 %v2512_v11 }
  0xd1   :  { %v3199_v58 = vpop.f32.mrf.mxu2  ;;  %v2413_v30 = vld [vmem:[#allocation2 + $0x2b0] sm:$0xf0] }
  0xd2   :  { %v2416_v33 = vor.u32 %v2899_v28, %v2413_v30  ;;  %v699_v57 = vadd.f32 %v3199_v58, %v3202_v5  ;;  %v2943_v28 = vld [vmem:[#allocation2 + $0x15c] sm:$0xf] }
  0xd4   :  { %844 = vmatpush.bf16.msra.mxu3 %v2488_v14 }
  0xd6   :  { %v735_v38 = vpop.f32.mrf.mxu0 }
  0xd7   :  { %v736_v39 = vadd.f32 %v735_v38, %v3188_v37  ;;  %v2392_v38 = vor.u32 %v2893_v34, %v2389_v35  ;;  %v2941_v35 = vld [vmem:[#allocation2 + $0x11c] sm:$0xf] }
  0xd8   :  { %v752_v40 = vpop.f32.mrf.mxu1  ;;  %845 = vmatpush.bf16.msra.mxu3 %v2464_v20  ;;  %v2571_v20 = vld [vmem:[#allocation2 + $0x1f8] sm:$0xf0] }
  0xd9   :  { %v753_v49 = vadd.f32 %v752_v40, %v736_v39  ;;  %v700_v6 = vpop.f32.mrf.mxu2  ;;  %v2887_v39 = vld [vmem:[#allocation2 + $0x214] sm:$0xf] }
  0xda   :  { %v3207_v8 = vadd.f32 %v700_v6, %v3202_v5  ;;  %v2365_v40 = vld [vmem:[#allocation2 + $0x230] sm:$0xf0] }
  0xdb   :  { %947 = vrot.lane.b32.xlu0 %v753_v49, %s3091_s8  ;;  %2537 = vmatpush.xpose.msk.msrb.mxu2 %vm861_vm0, %v753_v49  ;;  %v2368_v43 = vor.u32 %v2887_v39, %v2365_v40  ;;  %v140_v49 = vperm.slane %v3173_v45, 6 }
  0xdc   :  { %785 = vmatmul.bf16.gmra.mxu3 %v3150_v29 }
  0xdd   :  { %846 = vmatpush.bf16.msra.mxu3 %v2440_v24  ;;  %v152_v50 = vperm.slane %v140_v49, 0 }
  0xde   :  { %v737_v56 = vpop.f32.mrf.mxu0  ;;  %2538 = vmatmul.msk.f32.vlgmr.msrb.gmra.mxu2 %vm861_vm0, %v682_v52 }
  0xdf   :  { %v738_v36 = vadd.f32 %v737_v56, %v3188_v37  ;;  %v3228_v56 = vperm.slane %v134_v7, 2  ;;  %v2946_v7 = vld [vmem:[#allocation2 + $0x1b4] sm:$0xf0] }
  0xe0   :  { %v754_v54 = vpop.f32.mrf.mxu1 }
  0xe1   :  { %v703_v19 = vpop.f32.mrf.mxu2  ;;  %847 = vmatpush.bf16.msra.mxu3 %v2416_v33  ;;  %v3217_v41 = vadd.f32 %v754_v54, %v738_v36  ;;  %v2547_v36 = vld [vmem:[#allocation2 + $0x138] sm:$0xf0] }
  0xe2   :  { %v2947_v19 = vld [vmem:[#allocation2 + $0x1dc] sm:$0xf] }
  0xe3   :  { %945 = vrot.lane.b32.xlu0 %v682_v52, %s3091_s8  ;;  %v2574_v21 = vor.u32 %v2947_v19, %v2571_v20  ;;  %v2587_v19 = vld [vmem:[#allocation2 + $0x58] sm:$0xf] }
  0xe4   :  { %v2936_v20 = vld [vmem:[#allocation2 + $0x74] sm:$0xf0] }
  0xe5   :  { %848 = vmatpush.bf16.msra.mxu3 %v2392_v38  ;;  %1093 = vmatpush.bf16.msrb.mxu1 %v2574_v21  ;;  %v2550_v38 = vor.u32 %v2941_v35, %v2547_v36 }
  0xe6   :  { %v800_v3 = vpop.f32.mrf.mxu0 }
  0xe7   :  { %v2948_v3 = vld [vmem:[#allocation2 + $0x1f4] sm:$0xf0] }
  0xe8   :  { %v817_v4 = vpop.f32.mrf.mxu1  ;;  %v2570_v6 = vor.u32 %v2948_v3, %v2569_v2 }
  0xe9   :  { %v704_v32 = vpop.f32.mrf.mxu2  ;;  %849 = vmatpush.bf16.msra.mxu3 %v2368_v43  ;;  %v2561_v4 = vld [vmem:[#allocation2 + $0x198] sm:$0xf] }
  0xea   :  { %1080 = vmatpush.bf16.msrb.mxu0 %v2570_v6  ;;  %v2562_v58 = vor.u32 %v2946_v7, %v2561_v4 }
  0xec   :  { %850 = vmatmul.bf16.vlgmr.msra.gmra.mxu3 %v3132_v63  ;;  %v154_v63 = vperm.slane %v3228_v56, 0 }
  0xee   :  { %v801_v13 = vpop.f32.mrf.mxu0  ;;  %1081 = vmatpush.bf16.msrb.mxu0 %v2562_v58 }
  0xef   :  { %v2942_v13 = vld [vmem:[#allocation2 + $0x134] sm:$0xf0] }
  0xf0   :  { %v818_v15 = vpop.f32.mrf.mxu1  ;;  %v2546_v14 = vor.u32 %v2942_v13, %v2545_v12  ;;  %v2595_v13 = vld [vmem:[#allocation2 + $0x98] sm:$0xf] }
  0xf1   :  { %v766_v42 = vpop.f32.mrf.mxu2 }
  0xf6   :  { %v803_v23 = vpop.f32.mrf.mxu0 }
  0xf7   :  { %v804_v25 = vadd.f32 %v803_v23, %v153_v44 }
  0xf8   :  { %v820_v27 = vpop.f32.mrf.mxu1 }
  0xf9   :  { %v821_v31 = vadd.f32 %v820_v27, %v804_v25  ;;  %v767_v48 = vpop.f32.mrf.mxu2  ;;  %v2945_v25 = vld [vmem:[#allocation2 + $0x19c] sm:$0xf] }
  0xfa   :  { %v2563_v27 = vld [vmem:[#allocation2 + $0x1b8] sm:$0xf0] }
  0xfb   :  { %998 = vrot.lane.b32.xlu0 %v821_v31, %s3091_s8  ;;  %931 = vmatpush.msrb.mxu3 %v821_v31  ;;  %v2566_v30 = vor.u32 %v2945_v25, %v2563_v27  ;;  %v2555_v31 = vld [vmem:[#allocation2 + $0x178] sm:$0xf0]  ;;  %v2579_v27 = vld [vmem:[#allocation2 + $0x18] sm:$0xf] }
  0xfc   :  { %853 = vmatmul.bf16.gmra.mxu3 %v3150_v29  ;;  %v2558_v32 = vor.u32 %v2943_v28, %v2555_v31  ;;  %v2934_v28 = vld [vmem:[#allocation2 + $0x34] sm:$0xf0] }
  0xfd   :  { %1094 = vmatpush.bf16.msrb.mxu1 %v2566_v30  ;;  %v2933_v30 = vld [vmem:[#allocation2 + $0x1c] sm:$0xf]  ;;  %v2580_v31 = vor.u32 %v2934_v28, %v2579_v27 }
 0x101   :  { %v769_v37 = vpop.f32.mrf.mxu2  ;;  %1095 = vmatpush.bf16.msrb.mxu1 %v2558_v32  ;;  %v2581_v32 = vld [vmem:[#allocation2 + $0x38] sm:$0xf0] }
 0x102   :  { %v770_v22 = vadd.f32 %v769_v37, %v152_v50 }
 0x103   :  { %1578 = vrot.lane.b32.xlu0 %v3217_v41, %s3091_s8 }
 0x105   :  { %1096 = vmatpush.bf16.msrb.mxu1 %v2550_v38 }
 0x109   :  { %v771_v51 = vpop.f32.mrf.mxu2 }
 0x10a   :  { %v772_v52 = vadd.f32 %v771_v51, %v152_v50 }
 0x10b   :  { %1576 = vrot.lane.b32.xlu0 %v3184_v1, %s3091_s8 }
 0x111   :  { %v834_v53 = vpop.f32.mrf.mxu2 }
 0x119   :  { %v835_v60 = vpop.f32.mrf.mxu2 }
 0x121   :  { %v3226_v55 = vpop.f32.mrf.mxu2 }
 0x122   :  { %v838_v42 = vadd.f32 %v3226_v55, %v154_v63 }
 0x129   :  { %v839_v46 = vpop.f32.mrf.mxu2 }
 0x12a   :  { %v3231_v54 = vadd.f32 %v839_v46, %v154_v63 }
 0x12e   :  { %v715_v45 = vpop.f32.mrf.mxu3 }
 0x12f   :  { %v3235_v61 = vadd.f32 %v715_v45, %v699_v57 }
 0x136   :  { %v717_v29 = vpop.f32.mrf.mxu3 }
 0x137   :  { %v3239_v47 = vadd.f32 %v717_v29, %v3207_v8  ;;  %v2554_v8 = vor.u32 %v2944_v10, %v2553_v9  ;;  %v2603_v9 = vld [vmem:[#allocation2 + $0xd8] sm:$0xf] }
 0x138   :  { %v2940_v10 = vld [vmem:[#allocation2 + $0xf4] sm:$0xf0] }
 0x139   :  { %1082 = vmatpush.bf16.msrb.mxu0 %v2554_v8  ;;  %v2605_v8 = vld [vmem:[#allocation2 + $0xf8] sm:$0xf0] }
 0x13d   :  { %1083 = vmatpush.bf16.msrb.mxu0 %v2546_v14  ;;  %v2938_v14 = vld [vmem:[#allocation2 + $0xb4] sm:$0xf0] }
 0x13e   :  { %v720_v0 = vpop.f32.mrf.mxu3 }
 0x146   :  { %v721_v11 = vpop.f32.mrf.mxu3 }
 0x147   :  { %v2604_v11 = vor.u32 %v2940_v10, %v2603_v9 }
 0x14d   :  { %v948_v59 = vpop.permute.xlu0 %947 }
 0x14e   :  { %2540 = vmatpush.xpose.msk.msra.mxu2 %vm861_vm0, %v948_v59  ;;  %v783_v15 = vpop.f32.mrf.mxu3 }
 0x14f   :  { %v2937_v15 = vld [vmem:[#allocation2 + $0x9c] sm:$0xf] }
 0x152   :  { %1149 = vmatpush.bf16.msrb.mxu2 %v2604_v11 }
 0x155   :  { %v946_v62 = vpop.permute.xlu0 %945 }
 0x156   :  { %2541 = vmatmul.msk.f32.vlgmr.msra.gmra.mxu2 %vm861_vm0, %v946_v62  ;;  %v784_v18 = vpop.f32.mrf.mxu3 }
 0x157   :  { %v2597_v18 = vld [vmem:[#allocation2 + $0xb8] sm:$0xf0] }
 0x158   :  { %v2600_v21 = vor.u32 %v2937_v15, %v2597_v18 }
 0x15f   :  { %v786_v23 = vpop.f32.mrf.mxu3 }
 0x160   :  { %v787_v24 = vadd.f32 %v786_v23, %v770_v22  ;;  %v2935_v22 = vld [vmem:[#allocation2 + $0x5c] sm:$0xf] }
 0x161   :  { %v885_v5 = vpop.f32.mrf.mxu2  ;;  %v2589_v23 = vld [vmem:[#allocation2 + $0x78] sm:$0xf0] }
 0x162   :  { %v889_v26 = vsel %vm888_vm1, %v885_v5, -inf  ;;  %2611 = vmatpush.xpose.msk.msra.mxu0 %vm861_vm0, %v787_v24  ;;  %v2592_v25 = vor.u32 %v2935_v22, %v2589_v23 }
 0x163   :  { %890 = vmax.xlane.f32.xlu1 %v889_v26  ;;  %v2939_v26 = vld [vmem:[#allocation2 + $0xdc] sm:$0xf] }
 0x164   :  { %v2608_v12 = vor.u32 %v2939_v26, %v2605_v8 }
 0x167   :  { %v788_v33 = vpop.f32.mrf.mxu3 }
 0x168   :  { %v3244_v34 = vadd.f32 %v788_v33, %v772_v52  ;;  %v2584_v33 = vor.u32 %v2933_v30, %v2581_v32 }
 0x16d   :  { %v999_v17 = vpop.permute.xlu0 %998 }
 0x16e   :  { %1019 = vmatpush.msra.mxu3 %v999_v17  ;;  %v2596_v17 = vor.u32 %v2938_v14, %v2595_v13 }
 0x16f   :  { %v851_v39 = vpop.f32.mrf.mxu3 }
 0x170   :  { %1150 = vmatpush.bf16.msrb.mxu2 %v2596_v17 }
 0x177   :  { %v852_v40 = vpop.f32.mrf.mxu3 }
 0x17f   :  { %v854_v43 = vpop.f32.mrf.mxu3 }
 0x180   :  { %v3247_v48 = vadd.f32 %v854_v43, %v838_v42 }
 0x182   :  { %1239 = vmatpush.msra.mxu1 %v3247_v48 }
 0x1d6   :  { %v891_v37 = vpop.xlane.xlu1 %890 }
 0x1d7   :  { %v892_v49 = vsub.f32 %v885_v5, %v891_v37 }
 0x1d9   :  { %v893_v50 = vmul.f32 1.442695, %v892_v49  ;;  %v970_v51 = vpop.f32.mrf.mxu2 }
 0x1da   :  { %v973_v52 = vsel %vm888_vm1, %v970_v51, -inf }
 0x1db   :  { %3004 = vpow2.f32 %v893_v50  ;;  %974 = vmax.xlane.f32.xlu1 %v973_v52 }
 0x1e1   :  { %v3005_v53 = vpop.eup %3004 }
 0x1e2   :  { %v895_v60 = vsel %vm888_vm1, %v3005_v53, 0.0 }
 0x1e3   :  { %896 = vadd.xlane.f32.xlu2 %v895_v60 }
 0x1f4   :  { %1326 = vrot.lane.b32.xlu1 %v787_v24, %s3091_s8  ;;  %v2588_v24 = vor.u32 %v2936_v20, %v2587_v19 }
 0x1f6   :  { %1151 = vmatpush.bf16.msrb.mxu2 %v2588_v24 }
 0x1fa   :  { %1152 = vmatpush.bf16.msrb.mxu2 %v2580_v31 }
 0x24e   :  { %v975_v55 = vpop.xlane.xlu1 %974 }
 0x24f   :  { %v976_v56 = vsub.f32 %v970_v51, %v975_v55 }
 0x251   :  { %v977_v63 = vmul.f32 1.442695, %v976_v56 }
 0x253   :  { %3006 = vpow2.f32 %v977_v63 }
 0x256   :  { %v897_v46 = vpop.xlane.xlu2 %896 }
 0x257   :  { %3008 = vrcp.f32 %v897_v46  ;;  %v909_v0 = vand.u32 2147483648, %v897_v46  ;;  %v907_v3 = vand.u32 2147483647, %v897_v46  ;;  %vm903_vm3 = vweird.f32 %v897_v46 }
 0x259   :  { %v3253_v57 = vpop.eup %3006  ;;  %v910_v6 = vor.u32 1.1754944e-38, %v909_v0  ;;  %vm908_vm5 = vcmp.eq.f32.partialorder %v907_v3, 8.507059e+37  ;;  %v1579_v0 = vpop.permute.xlu0 %1578 }
 0x25a   :  { %v979_v45 = vsel %vm888_vm1, %v3253_v57, 0.0  ;;  %v805_v3 = vpop.f32.mrf.mxu0 }
 0x25b   :  { %980 = vadd.xlane.f32.xlu2 %v979_v45 }
 0x25d   :  { %v3009_v59 = vpop.eup %3008 }
 0x25e   :  { %v899_v29 = vmul.f32 %v3009_v59, %v897_v46  ;;  %vm904_vm2 = vweird.f32 %v3009_v59 }
 0x25f   :  { %vm905_vm4 = vmor %vm903_vm3, %vm904_vm2 }
 0x260   :  { %v900_v62 = vsub.f32 1.0, %v899_v29 }
 0x262   :  { %v901_v2 = vmul.f32 %v3009_v59, %v900_v62 }
 0x264   :  { %v902_v4 = vadd.f32 %v3009_v59, %v901_v2  ;;  %v1577_v2 = vpop.permute.xlu0 %1576 }
 0x266   :  { %v906_v7 = vsel %vm905_vm4, %v3009_v59, %v902_v4  ;;  %v1327_v46 = vpop.permute.xlu1 %1326  ;;  %v822_v4 = vpop.f32.mrf.mxu1 }
 0x267   :  { %v911_v58 = vsel %vm908_vm5, %v910_v6, %v906_v7 }
 0x268   :  { %v912_v5 = vmul.f32 %v3005_v53, %v911_v58  ;;  %v3262_v53 = vpop.f32.mrf.mxu3 }
 0x26a   :  { %2539 = vmatmul.msk.f32.vlgmr.msrb.gmra.mxu3 %vm888_vm1, %v912_v5 }
 0x26b   :  { %1162 = vmatpush.bf16.msrb.mxu3 %v2608_v12 }
 0x26f   :  { %1163 = vmatpush.bf16.msrb.mxu3 %v2600_v21 }
 0x273   :  { %1324 = vrot.lane.b32.xlu2 %v3235_v61, %s3091_s8  ;;  %1164 = vmatpush.bf16.msrb.mxu3 %v2592_v25 }
 0x277   :  { %1165 = vmatpush.bf16.msrb.mxu3 %v2584_v33 }
 0x2ce   :  { %v981_v35 = vpop.xlane.xlu2 %980 }
 0x2cf   :  { %3010 = vrcp.f32 %v981_v35  ;;  %v993_v40 = vand.u32 2147483648, %v981_v35  ;;  %v991_v43 = vand.u32 2147483647, %v981_v35  ;;  %vm987_vm7 = vweird.f32 %v981_v35 }
 0x2d1   :  { %v994_v49 = vor.u32 1.1754944e-38, %v993_v40  ;;  %vm992_vm9 = vcmp.eq.f32.partialorder %v991_v43, 8.507059e+37 }
 0x2d5   :  { %v3011_v36 = vpop.eup %3010 }
 0x2d6   :  { %v983_v38 = vmul.f32 %v3011_v36, %v981_v35  ;;  %vm988_vm6 = vweird.f32 %v3011_v36  ;;  %v1325_v62 = vpop.permute.xlu2 %1324 }
 0x2d7   :  { %vm989_vm8 = vmor %vm987_vm7, %vm988_vm6 }
 0x2d8   :  { %v984_v39 = vsub.f32 1.0, %v983_v38 }
 0x2da   :  { %v985_v42 = vmul.f32 %v3011_v36, %v984_v39 }
 0x2dc   :  { %v986_v37 = vadd.f32 %v3011_v36, %v985_v42 }
 0x2de   :  { %v990_v50 = vsel %vm989_vm8, %v3011_v36, %v986_v37  ;;  %v806_v36 = vadd.f32 %v805_v3, %v153_v44 }
 0x2df   :  { %v995_v51 = vsel %vm992_vm9, %v994_v49, %v990_v50 }
 0x2e0   :  { %v996_v52 = vmul.f32 %v3253_v57, %v995_v51  ;;  %v3307_v38 = vadd.f32 %v822_v4, %v806_v36  ;;  %v2677_v36 = vld [vmem:[#allocation2 + $0x3d8] sm:$0xf] }
 0x2e2   :  { %2542 = vmatmul.msk.f32.vlgmr.msra.gmra.mxu3 %vm888_vm1, %v996_v52 }
 0x2ed   :  { %v933_v60 = vpop.f32.mrf.mxu3 }
 0x2ee   :  { %v936_v55 = vpack.c.bf16 %v933_v60, %v933_v60 }
 0x2f0   :  { %2609 = vmatmul.msk.bf16.vlgmr.msrb.gmra.mxu2 %vm861_vm0, %v936_v55  ;;  %2610 = vmatmul.msk.bf16.vlgmr.msrb.gmra.mxu3 %vm861_vm0, %v936_v55 }
 0x365   :  { %v1021_v56 = vpop.f32.mrf.mxu3 }
 0x366   :  { %v1024_v63 = vpack.c.bf16 %v1021_v56, %v1021_v56 }
 0x368   :  { %2575 = vmatmul.msk.bf16.vlgmr.msrb.gmra.mxu0 %vm861_vm0, %v1024_v63  ;;  %2576 = vmatmul.msk.bf16.vlgmr.msrb.gmra.mxu1 %vm861_vm0, %v1024_v63 }
 0x369   :  { %2648 = vmatpush.xpose.msk.msrb.mxu0 %vm861_vm0, %v1327_v46 }
 0x373   :  { %v3269_v57 = vpop.f32.mrf.mxu2  ;;  %v3271_v45 = vpop.f32.mrf.mxu3 }
 0x378   :  { %2612 = vmatmul.msk.f32.vlgmr.msra.gmra.mxu0 %vm861_vm0, %v3235_v61 }
 0x379   :  { %2685 = vmatpush.xpose.msk.msra.mxu0 %vm861_vm0, %v3217_v41 }
 0x37b   :  { %v1156_v59 = vpop.f32.mrf.mxu2  ;;  %v1169_v29 = vpop.f32.mrf.mxu3 }
 0x37c   :  { %v2640_v59 = vld [vmem:[#allocation2 + $0x2d8] sm:$0xf] }
 0x37d   :  { %v2956_v29 = vld [vmem:[#allocation2 + $0x2f4] sm:$0xf0] }
 0x380   :  { %2649 = vmatmul.msk.f32.vlgmr.msrb.gmra.mxu0 %vm861_vm0, %v1325_v62  ;;  %v2641_v62 = vor.u32 %v2956_v29, %v2640_v59  ;;  %v2962_v59 = vld [vmem:[#allocation2 + $0x3b4] sm:$0xf0] }
 0x381   :  { %2688 = vmatpush.xpose.msk.msrb.mxu0 %vm861_vm0, %v1579_v0  ;;  %v2955_v0 = vld [vmem:[#allocation2 + $0x2dc] sm:$0xf]  ;;  %v2980_v29 = vld [vmem:[#allocation2 + $0x1f4] sm:$0xf0] }
 0x382   :  { %1300 = vmatpush.bf16.msra.mxu2 %v2641_v62  ;;  %v2961_v62 = vld [vmem:[#allocation2 + $0x39c] sm:$0xf] }
 0x388   :  { %2686 = vmatmul.msk.f32.vlgmr.msra.gmra.mxu0 %vm861_vm0, %v3184_v1 }
 0x390   :  { %2689 = vmatmul.msk.f32.vlgmr.msrb.gmra.mxu0 %vm861_vm0, %v1577_v2  ;;  %v2642_v2 = vld [vmem:[#allocation2 + $0x2f8] sm:$0xf0] }
 0x391   :  { %v2645_v4 = vor.u32 %v2955_v0, %v2642_v2  ;;  %v2671_v0 = vld [vmem:[#allocation2 + $0x3b8] sm:$0xf0] }
 0x393   :  { %1313 = vmatpush.bf16.msra.mxu3 %v2645_v4 }
 0x3e5   :  { %v3282_v61 = vpop.f32.mrf.mxu0  ;;  %v3284_v6 = vpop.f32.mrf.mxu1 }
 0x3ed   :  { %v1087_v41 = vpop.f32.mrf.mxu0  ;;  %v1100_v7 = vpop.f32.mrf.mxu1 }
 0x3ee   :  { %v2632_v41 = vld [vmem:[#allocation2 + $0x298] sm:$0xf] }
 0x3ef   :  { %v2954_v7 = vld [vmem:[#allocation2 + $0x2b4] sm:$0xf0] }
 0x3f5   :  { %v1194_v58 = vpop.f32.mrf.mxu0 }
 0x3f6   :  { %v1197_v5 = vsel %vm888_vm1, %v1194_v58, -inf }
 0x3f7   :  { %1198 = vmax.xlane.f32.xlu0 %v1197_v5  ;;  %v2953_v5 = vld [vmem:[#allocation2 + $0x29c] sm:$0xf] }
 0x3fd   :  { %v1349_v9 = vpop.f32.mrf.mxu0 }
 0x3fe   :  { %v1352_v10 = vsel %vm888_vm1, %v1349_v9, -inf }
 0x3ff   :  { %1353 = vmax.xlane.f32.xlu2 %v1352_v10 }
 0x405   :  { %v1517_v1 = vpop.f32.mrf.mxu0 }
 0x406   :  { %v1520_v26 = vsel %vm888_vm1, %v1517_v1, -inf }
 0x407   :  { %1521 = vmax.xlane.f32.xlu1 %v1520_v26  ;;  %v2624_v26 = vld [vmem:[#allocation2 + $0x258] sm:$0xf] }
 0x40d   :  { %v1601_v11 = vpop.f32.mrf.mxu0 }
 0x40e   :  { %v1604_v8 = vsel %vm888_vm1, %v1601_v11, -inf }
 0x40f   :  { %1605 = vmax.xlane.f32.xlu2 %v1604_v8 }
 0x46a   :  { %v1199_v12 = vpop.xlane.xlu0 %1198 }
 0x46b   :  { %v1200_v13 = vsub.f32 %v1194_v58, %v1199_v12  ;;  %v2633_v58 = vor.u32 %v2954_v7, %v2632_v41  ;;  %v2674_v7 = vor.u32 %v2961_v62, %v2671_v0  ;;  %v2979_v62 = vld [vmem:[#allocation2 + $0x1dc] sm:$0xf] }
 0x46c   :  { %v2719_v0 = vld [vmem:[#allocation2 + $0x1f8] sm:$0xf0] }
 0x46d   :  { %v1201_v14 = vmul.f32 1.442695, %v1200_v13  ;;  %v2951_v13 = vld [vmem:[#allocation2 + $0x25c] sm:$0xf]  ;;  %1301 = vmatpush.bf16.msra.mxu2 %v2633_v58 }
 0x46f   :  { %3012 = vpow2.f32 %v1201_v14  ;;  %v2626_v14 = vld [vmem:[#allocation2 + $0x278] sm:$0xf0] }
 0x472   :  { %v1354_v15 = vpop.xlane.xlu2 %1353 }
 0x473   :  { %v1355_v17 = vsub.f32 %v1349_v9, %v1354_v15  ;;  %v2634_v9 = vld [vmem:[#allocation2 + $0x2b8] sm:$0xf0] }
 0x475   :  { %v3013_v18 = vpop.eup %3012  ;;  %v1356_v19 = vmul.f32 1.442695, %v1355_v17 }
 0x476   :  { %v1203_v20 = vsel %vm888_vm1, %v3013_v18, 0.0 }
 0x477   :  { %3014 = vpow2.f32 %v1356_v19  ;;  %1204 = vadd.xlane.f32.xlu0 %v1203_v20  ;;  %v2958_v19 = vld [vmem:[#allocation2 + $0x334] sm:$0xf0] }
 0x47a   :  { %v1522_v21 = vpop.xlane.xlu1 %1521 }
 0x47b   :  { %v1523_v22 = vsub.f32 %v1517_v1, %v1522_v21  ;;  %v2637_v1 = vor.u32 %v2953_v5, %v2634_v9 }
 0x47d   :  { %v3291_v23 = vpop.eup %3014  ;;  %v1524_v24 = vmul.f32 1.442695, %v1523_v22  ;;  %1314 = vmatpush.bf16.msra.mxu3 %v2637_v1 }
 0x47e   :  { %v1358_v25 = vsel %vm888_vm1, %v3291_v23, 0.0 }
 0x47f   :  { %3016 = vpow2.f32 %v1524_v24  ;;  %1359 = vadd.xlane.f32.xlu1 %v1358_v25  ;;  %v2629_v24 = vor.u32 %v2951_v13, %v2626_v14  ;;  %v2616_v25 = vld [vmem:[#allocation2 + $0x218] sm:$0xf]  ;;  %v2959_v14 = vld [vmem:[#allocation2 + $0x35c] sm:$0xf] }
 0x480   :  { %v2960_v13 = vld [vmem:[#allocation2 + $0x374] sm:$0xf0] }
 0x481   :  { %1315 = vmatpush.bf16.msra.mxu3 %v2629_v24 }
 0x482   :  { %v1606_v27 = vpop.xlane.xlu2 %1605 }
 0x483   :  { %v1607_v28 = vsub.f32 %v1601_v11, %v1606_v27  ;;  %v2952_v11 = vld [vmem:[#allocation2 + $0x274] sm:$0xf0] }
 0x484   :  { %v2625_v20 = vor.u32 %v2952_v11, %v2624_v26  ;;  %v2950_v27 = vld [vmem:[#allocation2 + $0x234] sm:$0xf0] }
 0x485   :  { %v3295_v30 = vpop.eup %3016  ;;  %v1608_v31 = vmul.f32 1.442695, %v1607_v28 }
 0x486   :  { %v1526_v32 = vsel %vm888_vm1, %v3295_v30, 0.0  ;;  %1302 = vmatpush.bf16.msra.mxu2 %v2625_v20  ;;  %v2957_v20 = vld [vmem:[#allocation2 + $0x31c] sm:$0xf] }
 0x487   :  { %3018 = vpow2.f32 %v1608_v31  ;;  %1527 = vadd.xlane.f32.xlu2 %v1526_v32  ;;  %v2949_v31 = vld [vmem:[#allocation2 + $0x21c] sm:$0xf] }
 0x488   :  { %v2618_v32 = vld [vmem:[#allocation2 + $0x238] sm:$0xf0] }
 0x48d   :  { %v3299_v33 = vpop.eup %3018 }
 0x48e   :  { %v1610_v35 = vsel %vm888_vm1, %v3299_v33, 0.0 }
 0x48f   :  { %1611 = vadd.xlane.f32.xlu0 %v1610_v35 }
 0x498   :  { %1377 = vrot.lane.b32.xlu1 %v3247_v48, %s3091_s8 }
 0x49f   :  { %1629 = vrot.lane.b32.xlu2 %v3307_v38, %s3091_s8 }
 0x4a0   :  { %1955 = vrot.lane.b32.xlu1 %v3239_v47, %s3091_s8 }
 0x4a3   :  { %1957 = vrot.lane.b32.xlu0 %v3244_v34, %s3091_s8 }
 0x4ea   :  { %v1205_v39 = vpop.xlane.xlu0 %1204 }
 0x4eb   :  { %3020 = vrcp.f32 %v1205_v39  ;;  %v1217_v16 = vand.u32 2147483648, %v1205_v39  ;;  %v1215_v37 = vand.u32 2147483647, %v1205_v39  ;;  %vm1211_vm11 = vweird.f32 %v1205_v39 }
 0x4ed   :  { %v1218_v51 = vor.u32 1.1754944e-38, %v1217_v16  ;;  %vm1216_vm13 = vcmp.eq.f32.partialorder %v1215_v37, 8.507059e+37 }
 0x4f1   :  { %v3021_v40 = vpop.eup %3020 }
 0x4f2   :  { %v1207_v42 = vmul.f32 %v3021_v40, %v1205_v39  ;;  %v1360_v43 = vpop.xlane.xlu1 %1359  ;;  %vm1212_vm10 = vweird.f32 %v3021_v40  ;;  %v2964_v39 = vld [vmem:[#allocation2 + $0x3f4] sm:$0xf0] }
 0x4f3   :  { %3022 = vrcp.f32 %v1360_v43  ;;  %vm1213_vm12 = vmor %vm1211_vm11, %vm1212_vm10  ;;  %v1372_v12 = vand.u32 2147483648, %v1360_v43  ;;  %vm1366_vm15 = vweird.f32 %v1360_v43  ;;  %v1370_v15 = vand.u32 2147483647, %v1360_v43 }
 0x4f4   :  { %v1208_v48 = vsub.f32 1.0, %v1207_v42  ;;  %v2617_v42 = vor.u32 %v2950_v27, %v2616_v25  ;;  %v2751_v25 = vld [vmem:[#allocation2 + $0xd8] sm:$0xf]  ;;  %v2971_v27 = vld [vmem:[#allocation2 + $0xdc] sm:$0xf] }
 0x4f5   :  { %v1373_v28 = vor.u32 1.1754944e-38, %v1372_v12  ;;  %vm1371_vm3 = vcmp.eq.f32.partialorder %v1370_v15, 8.507059e+37  ;;  %v2661_v12 = vld [vmem:[#allocation2 + $0x358] sm:$0xf] }
 0x4f6   :  { %v1209_v44 = vmul.f32 %v3021_v40, %v1208_v48  ;;  %v2679_v48 = vld [vmem:[#allocation2 + $0x3f8] sm:$0xf0]  ;;  %1303 = vmatpush.bf16.msra.mxu2 %v2617_v42  ;;  %v2662_v15 = vor.u32 %v2960_v13, %v2661_v12  ;;  %v2693_v12 = vld [vmem:[#allocation2 + $0x118] sm:$0xf] }
 0x4f7   :  { %v2745_v42 = vld [vmem:[#allocation2 + $0xb8] sm:$0xf0]  ;;  %v2974_v13 = vld [vmem:[#allocation2 + $0x134] sm:$0xf0] }
 0x4f8   :  { %v1210_v49 = vadd.f32 %v3021_v40, %v1209_v44  ;;  %v2621_v44 = vor.u32 %v2949_v31, %v2618_v32 }
 0x4f9   :  { %v3023_v50 = vpop.eup %3022 }
 0x4fa   :  { %v1214_v52 = vsel %vm1213_vm12, %v3021_v40, %v1210_v49  ;;  %v1362_v60 = vmul.f32 %v3023_v50, %v1360_v43  ;;  %v3315_v55 = vpop.xlane.xlu2 %1527  ;;  %vm1367_vm14 = vweird.f32 %v3023_v50  ;;  %v2963_v43 = vld [vmem:[#allocation2 + $0x3dc] sm:$0xf]  ;;  %1316 = vmatpush.bf16.msra.mxu3 %v2621_v44 }
 0x4fb   :  { %v1219_v56 = vsel %vm1216_vm13, %v1218_v51, %v1214_v52  ;;  %3024 = vrcp.f32 %v3315_v55  ;;  %vm3325_vm2 = vmor %vm1366_vm15, %vm1367_vm14  ;;  %vm1534_vm5 = vweird.f32 %v3315_v55  ;;  %v1540_v49 = vand.u32 2147483648, %v3315_v55  ;;  %v2967_v44 = vld [vmem:[#allocation2 + $0x5c] sm:$0xf] }
 0x4fc   :  { %v1363_v63 = vsub.f32 1.0, %v1362_v60  ;;  %v1220_v46 = vmul.f32 %v3013_v18, %v1219_v56  ;;  %v1538_v51 = vand.u32 2147483647, %v3315_v55 }
 0x4fe   :  { %v1364_v3 = vmul.f32 %v3023_v50, %v1363_v63  ;;  %2613 = vmatmul.msk.f32.vlgmr.msra.gmra.mxu1 %vm888_vm1, %v1220_v46  ;;  %v2682_v63 = vor.u32 %v2963_v43, %v2679_v48  ;;  %v2669_v46 = vld [vmem:[#allocation2 + $0x398] sm:$0xf]  ;;  %vm1539_vm7 = vcmp.eq.f32.partialorder %v1538_v51, 8.507059e+37 }
 0x4ff   :  { %v2670_v4 = vor.u32 %v2962_v59, %v2669_v46  ;;  %v2735_v48 = vld [vmem:[#allocation2 + $0x58] sm:$0xf] }
 0x500   :  { %v1365_v10 = vadd.f32 %v3023_v50, %v1364_v3  ;;  %1472 = vmatpush.bf16.msrb.mxu3 %v2682_v63  ;;  %v2727_v51 = vld [vmem:[#allocation2 + $0x18] sm:$0xf]  ;;  %v2729_v63 = vld [vmem:[#allocation2 + $0x38] sm:$0xf0] }
 0x501   :  { %v3319_v8 = vpop.eup %3024  ;;  %v2717_v59 = vld [vmem:[#allocation2 + $0x1d8] sm:$0xf] }
 0x502   :  { %v1530_v17 = vmul.f32 %v3319_v8, %v3315_v55  ;;  %v3323_v18 = vpop.xlane.xlu0 %1611  ;;  %v1369_v21 = vsel %vm3325_vm2, %v3023_v50, %v1365_v10  ;;  %vm1535_vm4 = vweird.f32 %v3319_v8  ;;  %v2678_v50 = vor.u32 %v2964_v39, %v2677_v36  ;;  %v1630_v3 = vpop.permute.xlu2 %1629  ;;  %v2970_v36 = vld [vmem:[#allocation2 + $0xb4] sm:$0xf0] }
 0x503   :  { %3026 = vrcp.f32 %v3323_v18  ;;  %v1374_v40 = vsel %vm1371_vm3, %v1373_v28, %v1369_v21  ;;  %vm3340_vm6 = vmor %vm1534_vm5, %vm1535_vm4  ;;  %v1624_v9 = vand.u32 2147483648, %v3323_v18  ;;  %vm1618_vm9 = vweird.f32 %v3323_v18  ;;  %v2753_v28 = vld [vmem:[#allocation2 + $0xf8] sm:$0xf0] }
 0x504   :  { %v1531_v22 = vsub.f32 1.0, %v1530_v17  ;;  %v1375_v56 = vmul.f32 %v3291_v23, %v1374_v40  ;;  %v1541_v23 = vor.u32 1.1754944e-38, %v1540_v49  ;;  %1459 = vmatpush.bf16.msrb.mxu2 %v2678_v50  ;;  %v1622_v10 = vand.u32 2147483647, %v3323_v18  ;;  %1473 = vmatpush.bf16.msrb.mxu3 %v2674_v7  ;;  %v2663_v17 = vld [vmem:[#allocation2 + $0x378] sm:$0xf0] }
 0x505   :  { %v1625_v26 = vor.u32 1.1754944e-38, %v1624_v9  ;;  %v2756_v32 = vor.u32 %v2971_v27, %v2753_v28  ;;  %v2969_v40 = vld [vmem:[#allocation2 + $0x9c] sm:$0xf]  ;;  %v859_v27 = vld [vmem:[%s3415_s2 + $0x6] sm:$0x3]  ;;  %s3092_s2 = smov [#allocation5]  }
 0x506   :  { %v1532_v35 = vmul.f32 %v3319_v8, %v1531_v22  ;;  %vm1623_vm11 = vcmp.eq.f32.partialorder %v1622_v10, 8.507059e+37  ;;  %v2655_v22 = vld [vmem:[#allocation2 + $0x338] sm:$0xf0]  ;;  %v2748_v43 = vor.u32 %v2969_v40, %v2745_v42  ;;  %v2701_v10 = vld [vmem:[#allocation2 + $0x158] sm:$0xf]  ;;  %v860_v28 = vunpack.c.l.bf16 %v859_v27  ;;  %s2122_s11 = sshll.u32 %s3092_s2, 4  ;;  %s2123_s11 = int_to_ptr.vmem [resolvable:$true] %s2122_s11 }
 0x507   :  { %v2658_v24 = vor.u32 %v2957_v20, %v2655_v22  ;;  %v2977_v7 = vld [vmem:[#allocation2 + $0x19c] sm:$0xf]  ;;  %v857_v20 = vadd.f32 %v3262_v53, %v3231_v54 }
 0x508   :  { %v1533_v16 = vadd.f32 %v3319_v8, %v1532_v35  ;;  %1460 = vmatpush.bf16.msrb.mxu2 %v2670_v4  ;;  %v2743_v35 = vld [vmem:[#allocation2 + $0x98] sm:$0xf] }
 0x509   :  { %v3027_v37 = vpop.eup %3026  ;;  %v2744_v39 = vor.u32 %v2970_v36, %v2743_v35  ;;  %v3375_v35 = vperm.slane %v860_v28, 0  ;;  %v3377_v36 = vperm.slane %v860_v28, 2 }
 0x50a   :  { %v1614_v52 = vmul.f32 %v3027_v37, %v3323_v18  ;;  %v1378_v60 = vpop.permute.xlu1 %1377  ;;  %v1537_v55 = vsel %vm3340_vm6, %v3319_v8, %v1533_v16  ;;  %vm1619_vm8 = vweird.f32 %v3027_v37  ;;  %v2666_v18 = vor.u32 %v2959_v14, %v2663_v17  ;;  %v2968_v16 = vld [vmem:[#allocation2 + $0x74] sm:$0xf0]  ;;  %v2973_v14 = vld [vmem:[#allocation2 + $0x11c] sm:$0xf] }
 0x50b   :  { %1398 = vmatpush.msrb.mxu1 %v1378_v60  ;;  %v1542_v58 = vsel %vm1539_vm7, %v1541_v23, %v1537_v55  ;;  %vm1620_vm10 = vmor %vm1618_vm9, %vm1619_vm8  ;;  %v2736_v49 = vor.u32 %v2968_v16, %v2735_v48  ;;  %v2965_v60 = vld [vmem:[#allocation2 + $0x1c] sm:$0xf]  ;;  %v2722_v23 = vor.u32 %v2979_v62, %v2719_v0  ;;  %v2694_v17 = vor.u32 %v2974_v13, %v2693_v12 }
 0x50c   :  { %v1615_v2 = vsub.f32 1.0, %v1614_v52  ;;  %2650 = vmatmul.msk.f32.vlgmr.msrb.gmra.mxu1 %vm888_vm1, %v1375_v56  ;;  %v1543_v1 = vmul.f32 %v3295_v30, %v1542_v58  ;;  %1461 = vmatpush.bf16.msrb.mxu2 %v2662_v15  ;;  %v2653_v30 = vld [vmem:[#allocation2 + $0x318] sm:$0xf]  ;;  %v2732_v46 = vor.u32 %v2965_v60, %v2729_v63  ;;  %v2711_v58 = vld [vmem:[#allocation2 + $0x1b8] sm:$0xf0]  ;;  %v1489_v48 = vperm.slane %v3377_v36, 0 }
 0x50d   :  { %1562 = vmatpush.msra.mxu1 %v3307_v38  ;;  %1474 = vmatpush.bf16.msrb.mxu3 %v2666_v18  ;;  %v2654_v21 = vor.u32 %v2958_v19, %v2653_v30  ;;  %v2966_v52 = vld [vmem:[#allocation2 + $0x34] sm:$0xf0]  ;;  %v2714_v9 = vor.u32 %v2977_v7, %v2711_v58  ;;  %v2695_v15 = vld [vmem:[#allocation2 + $0x138] sm:$0xf0] }
 0x50e   :  { %v1616_v41 = vmul.f32 %v3027_v37, %v1615_v2  ;;  %v2728_v56 = vor.u32 %v2966_v52, %v2727_v51  ;;  %v2718_v2 = vor.u32 %v2980_v29, %v2717_v59  ;;  %v2698_v18 = vor.u32 %v2973_v14, %v2695_v15  ;;  %v2987_v12 = vld [vmem:[#allocation2 + $0x2dc] sm:$0xf]  ;;  %v2780_v15 = vld [vmem:[#allocation2 + $0x298] sm:$0xf] }
 0x50f   :  { %1650 = vmatpush.msrb.mxu1 %v1630_v3  ;;  %v2709_v3 = vld [vmem:[#allocation2 + $0x198] sm:$0xf]  ;;  %v2790_v14 = vld [vmem:[#allocation2 + $0x2f8] sm:$0xf0] }
 0x510   :  { %v1617_v5 = vadd.f32 %v3027_v37, %v1616_v41  ;;  %1462 = vmatpush.bf16.msrb.mxu2 %v2654_v21  ;;  %v2978_v41 = vld [vmem:[#allocation2 + $0x1b4] sm:$0xf0] }
 0x511   :  { %1475 = vmatpush.bf16.msrb.mxu3 %v2658_v24 }
 0x512   :  { %v1621_v38 = vsel %vm1620_vm10, %v3027_v37, %v1617_v5  ;;  %v2737_v37 = vld [vmem:[#allocation2 + $0x78] sm:$0xf0]  ;;  %v2710_v5 = vor.u32 %v2978_v41, %v2709_v3  ;;  %v1956_v54 = vpop.permute.xlu1 %1955 }
 0x513   :  { %v1626_v11 = vsel %vm1623_vm11, %v1625_v26, %v1621_v38  ;;  %v2740_v50 = vor.u32 %v2967_v44, %v2737_v37  ;;  %v2975_v38 = vld [vmem:[#allocation2 + $0x15c] sm:$0xf] }
 0x514   :  { %2687 = vmatmul.msk.f32.vlgmr.msra.gmra.mxu1 %vm888_vm1, %v1543_v1  ;;  %v1627_v8 = vmul.f32 %v3299_v33, %v1626_v11  ;;  %v2972_v33 = vld [vmem:[#allocation2 + $0xf4] sm:$0xf0]  ;;  %v2703_v26 = vld [vmem:[#allocation2 + $0x178] sm:$0xf0] }
 0x515   :  { %v2752_v31 = vor.u32 %v2972_v33, %v2751_v25  ;;  %1793 = vmatpush.bf16.msra.mxu1 %v2756_v32  ;;  %v2976_v1 = vld [vmem:[#allocation2 + $0x174] sm:$0xf0]  ;;  %v1958_v33 = vpop.permute.xlu0 %1957 }
 0x516   :  { %v2702_v11 = vor.u32 %v2976_v1, %v2701_v10 }
 0x517   :  { %1780 = vmatpush.bf16.msra.mxu0 %v2752_v31 }
 0x519   :  { %1794 = vmatpush.bf16.msra.mxu1 %v2748_v43  ;;  %v1488_v43 = vperm.slane %v3375_v35, 0 }
 0x51b   :  { %1781 = vmatpush.bf16.msra.mxu0 %v2744_v39  ;;  %v1155_v39 = vadd.f32 %v3269_v57, %v3282_v61 }
 0x51c   :  { %2690 = vmatmul.msk.f32.vlgmr.msrb.gmra.mxu1 %vm888_vm1, %v1627_v8  ;;  %v2706_v8 = vor.u32 %v2975_v38, %v2703_v26 }
 0x51d   :  { %1795 = vmatpush.bf16.msra.mxu1 %v2740_v50 }
 0x51f   :  { %1782 = vmatpush.bf16.msra.mxu0 %v2736_v49 }
 0x521   :  { %1796 = vmatpush.bf16.msra.mxu1 %v2732_v46 }
 0x523   :  { %1783 = vmatpush.bf16.msra.mxu0 %v2728_v56 }
 0x57b   :  { %v1241_v55 = vpop.f32.mrf.mxu1 }
 0x57c   :  { %v1244_v4 = vpack.c.bf16 %v1241_v55, %v1241_v55 }
 0x57e   :  { %2646 = vmatmul.msk.bf16.vlgmr.msra.gmra.mxu2 %vm861_vm0, %v1244_v4  ;;  %2647 = vmatmul.msk.bf16.vlgmr.msra.gmra.mxu3 %vm861_vm0, %v1244_v4 }
 0x57f   :  { %1711 = vmatpush.bf16.msra.mxu2 %v2718_v2  ;;  %1724 = vmatpush.bf16.msra.mxu3 %v2722_v23 }
 0x583   :  { %1712 = vmatpush.bf16.msra.mxu2 %v2710_v5  ;;  %1725 = vmatpush.bf16.msra.mxu3 %v2714_v9 }
 0x587   :  { %1713 = vmatpush.bf16.msra.mxu2 %v2702_v11  ;;  %1726 = vmatpush.bf16.msra.mxu3 %v2706_v8  ;;  %v2788_v11 = vld [vmem:[#allocation2 + $0x2d8] sm:$0xf] }
 0x588   :  { %v2988_v8 = vld [vmem:[#allocation2 + $0x2f4] sm:$0xf0] }
 0x589   :  { %v1400_v30 = vpop.f32.mrf.mxu1  ;;  %v2789_v13 = vor.u32 %v2988_v8, %v2788_v11  ;;  %v2819_v11 = vld [vmem:[#allocation2 + $0x3b8] sm:$0xf0] }
 0x58a   :  { %v1403_v19 = vpack.c.bf16 %v1400_v30, %v1400_v30  ;;  %v2985_v30 = vld [vmem:[#allocation2 + $0x29c] sm:$0xf] }
 0x58b   :  { %1714 = vmatpush.bf16.msra.mxu2 %v2694_v17  ;;  %1727 = vmatpush.bf16.msra.mxu3 %v2698_v18  ;;  %v2986_v17 = vld [vmem:[#allocation2 + $0x2b4] sm:$0xf0]  ;;  %v2793_v18 = vor.u32 %v2987_v12, %v2790_v14  ;;  %v2991_v14 = vld [vmem:[#allocation2 + $0x35c] sm:$0xf] }
 0x58c   :  { %1931 = vmatpush.bf16.msrb.mxu0 %v2789_v13  ;;  %v2809_v12 = vld [vmem:[#allocation2 + $0x358] sm:$0xf] }
 0x58d   :  { %1944 = vmatpush.bf16.msrb.mxu1 %v2793_v18  ;;  %v2992_v13 = vld [vmem:[#allocation2 + $0x374] sm:$0xf0] }
 0x58e   :  { %2683 = vmatmul.msk.bf16.vlgmr.msrb.gmra.mxu2 %vm861_vm0, %v1403_v19  ;;  %2684 = vmatmul.msk.bf16.vlgmr.msrb.gmra.mxu3 %vm861_vm0, %v1403_v19  ;;  %v2782_v19 = vld [vmem:[#allocation2 + $0x2b8] sm:$0xf0]  ;;  %v2801_v18 = vld [vmem:[#allocation2 + $0x318] sm:$0xf] }
 0x58f   :  { %2759 = vmatpush.xpose.msk.msrb.mxu2 %vm861_vm0, %v3244_v34  ;;  %1870 = vmatpush.msrb.mxu3 %v857_v20 }
 0x591   :  { %v1564_v21 = vpop.f32.mrf.mxu1 }
 0x592   :  { %v1567_v22 = vpack.c.bf16 %v1564_v21, %v1564_v21 }
 0x594   :  { %2757 = vmatmul.msk.bf16.vlgmr.msra.gmra.mxu0 %vm861_vm0, %v1567_v22  ;;  %2758 = vmatmul.msk.bf16.vlgmr.msra.gmra.mxu1 %vm861_vm0, %v1567_v22  ;;  %v2785_v22 = vor.u32 %v2985_v30, %v2782_v19  ;;  %v2990_v30 = vld [vmem:[#allocation2 + $0x334] sm:$0xf0] }
 0x596   :  { %1945 = vmatpush.bf16.msrb.mxu1 %v2785_v22  ;;  %v2802_v22 = vor.u32 %v2990_v30, %v2801_v18 }
 0x599   :  { %v1652_v24 = vpop.f32.mrf.mxu1 }
 0x59a   :  { %v1655_v25 = vpack.c.bf16 %v1652_v24, %v1652_v24  ;;  %v2772_v24 = vld [vmem:[#allocation2 + $0x258] sm:$0xf] }
 0x59e   :  { %2723 = vmatmul.msk.bf16.vlgmr.msra.gmra.mxu2 %vm861_vm0, %v1655_v25  ;;  %2724 = vmatmul.msk.bf16.vlgmr.msra.gmra.mxu3 %vm861_vm0, %v1655_v25  ;;  %v2984_v25 = vld [vmem:[#allocation2 + $0x274] sm:$0xf0] }
 0x59f   :  { %2796 = vmatpush.xpose.msk.msra.mxu2 %vm861_vm0, %v1958_v33  ;;  %v2983_v33 = vld [vmem:[#allocation2 + $0x25c] sm:$0xf] }
 0x5ae   :  { %2760 = vmatmul.msk.f32.vlgmr.msrb.gmra.mxu2 %vm861_vm0, %v3239_v47  ;;  %v1168_v47 = vadd.f32 %v3271_v45, %v3284_v6 }
 0x5b6   :  { %2797 = vmatmul.msk.f32.vlgmr.msra.gmra.mxu2 %vm861_vm0, %v1956_v54  ;;  %v2774_v54 = vld [vmem:[#allocation2 + $0x278] sm:$0xf0] }
 0x601   :  { %v1305_v34 = vpop.f32.mrf.mxu2  ;;  %v1318_v53 = vpop.f32.mrf.mxu3 }
 0x602   :  { %v1322_v40 = vadd.f32 %v1305_v34, %v1155_v39  ;;  %v1323_v42 = vadd.f32 %v1318_v53, %v1168_v47  ;;  %v2773_v34 = vor.u32 %v2984_v25, %v2772_v24  ;;  %v2777_v53 = vor.u32 %v2983_v33, %v2774_v54 }
 0x604   :  { %1946 = vmatpush.bf16.msrb.mxu1 %v2777_v53 }
 0x609   :  { %v1307_v31 = vpop.f32.mrf.mxu2  ;;  %v1320_v32 = vpop.f32.mrf.mxu3 }
 0x611   :  { %v1464_v16 = vpop.f32.mrf.mxu2  ;;  %v1477_v44 = vpop.f32.mrf.mxu3 }
 0x612   :  { %v1481_v37 = vadd.f32 %v1464_v16, %v1322_v40  ;;  %v1482_v49 = vadd.f32 %v1477_v44, %v1323_v42  ;;  %v1785_v50 = vpop.f32.mrf.mxu0  ;;  %v1798_v51 = vpop.f32.mrf.mxu1 }
 0x614   :  { %v1490_v52 = vadd.f32 %v1488_v43, %v1481_v37  ;;  %v1491_v57 = vadd.f32 %v1489_v48, %v1482_v49 }
 0x616   :  { %1492 = vst [vmem:[#allocation5] sm:$0xff] %v1490_v52 }
 0x617   :  { %1493 = vst [vmem:[#allocation5 + $0x8] sm:$0xff] %v1491_v57 }
 0x619   :  { %v1466_v45 = vpop.f32.mrf.mxu2  ;;  %v1479_v61 = vpop.f32.mrf.mxu3 }
 0x61a   :  { %v1787_v6 = vpop.f32.mrf.mxu0  ;;  %v1800_v60 = vpop.f32.mrf.mxu1 }
 0x621   :  { %v1716_v56 = vpop.f32.mrf.mxu2  ;;  %v1729_v63 = vpop.f32.mrf.mxu3 }
 0x622   :  { %v3389_v46 = vadd.f32 %v1785_v50, %v1716_v56  ;;  %v3391_v59 = vadd.f32 %v1798_v51, %v1729_v63 }
 0x629   :  { %v1718_v29 = vpop.f32.mrf.mxu2  ;;  %v1731_v62 = vpop.f32.mrf.mxu3 }
 0x62a   :  { %v2764_v62 = vld [vmem:[#allocation2 + $0x218] sm:$0xf] }
 0x631   :  { %v1825_v0 = vpop.f32.mrf.mxu2 }
 0x632   :  { %v1828_v55 = vsel %vm888_vm1, %v1825_v0, -inf }
 0x633   :  { %1829 = vmax.xlane.f32.xlu0 %v1828_v55  ;;  %v2981_v55 = vld [vmem:[#allocation2 + $0x21c] sm:$0xf] }
 0x639   :  { %v1980_v2 = vpop.f32.mrf.mxu2 }
 0x63a   :  { %v1983_v23 = vsel %vm888_vm1, %v1980_v2, -inf }
 0x63b   :  { %1984 = vmax.xlane.f32.xlu2 %v1983_v23  ;;  %v2766_v23 = vld [vmem:[#allocation2 + $0x238] sm:$0xf0] }
 0x653   :  { %2008 = vrot.lane.b32.xlu2 %v857_v20, %s3091_s8  ;;  %v2781_v20 = vor.u32 %v2986_v17, %v2780_v15  ;;  %v2810_v15 = vor.u32 %v2992_v13, %v2809_v12  ;;  %v2811_v17 = vld [vmem:[#allocation2 + $0x378] sm:$0xf0] }
 0x654   :  { %v2814_v19 = vor.u32 %v2991_v14, %v2811_v17 }
 0x655   :  { %1932 = vmatpush.bf16.msrb.mxu0 %v2781_v20  ;;  %v2989_v20 = vld [vmem:[#allocation2 + $0x31c] sm:$0xf] }
 0x659   :  { %1933 = vmatpush.bf16.msrb.mxu0 %v2773_v34 }
 0x6a6   :  { %v1830_v3 = vpop.xlane.xlu0 %1829 }
 0x6a7   :  { %v1831_v4 = vsub.f32 %v1825_v0, %v1830_v3  ;;  %v2982_v0 = vld [vmem:[#allocation2 + $0x234] sm:$0xf0]  ;;  %v2769_v3 = vor.u32 %v2981_v55, %v2766_v23 }
 0x6a9   :  { %v1832_v41 = vmul.f32 1.442695, %v1831_v4  ;;  %1947 = vmatpush.bf16.msrb.mxu1 %v2769_v3  ;;  %v2825_v4 = vld [vmem:[#allocation2 + $0x3d8] sm:$0xf] }
 0x6ab   :  { %3028 = vpow2.f32 %v1832_v41  ;;  %v2996_v41 = vld [vmem:[#allocation2 + $0x3f4] sm:$0xf0] }
 0x6ae   :  { %v1985_v7 = vpop.xlane.xlu2 %1984 }
 0x6af   :  { %v1986_v58 = vsub.f32 %v1980_v2, %v1985_v7  ;;  %v2765_v2 = vor.u32 %v2982_v0, %v2764_v62  ;;  %v2995_v7 = vld [vmem:[#allocation2 + $0x3dc] sm:$0xf] }
 0x6b1   :  { %v3029_v5 = vpop.eup %3028  ;;  %v1987_v9 = vmul.f32 1.442695, %v1986_v58  ;;  %1934 = vmatpush.bf16.msrb.mxu0 %v2765_v2  ;;  %v2826_v58 = vor.u32 %v2996_v41, %v2825_v4 }
 0x6b2   :  { %v1834_v10 = vsel %vm888_vm1, %v3029_v5, 0.0 }
 0x6b3   :  { %3030 = vpow2.f32 %v1987_v9  ;;  %1835 = vadd.xlane.f32.xlu1 %v1834_v10  ;;  %v2817_v10 = vld [vmem:[#allocation2 + $0x398] sm:$0xf] }
 0x6b5   :  { %2090 = vmatpush.bf16.msra.mxu0 %v2826_v58 }
 0x6b6   :  { %v2009_v1 = vpop.permute.xlu2 %2008 }
 0x6b7   :  { %2029 = vmatpush.msra.mxu3 %v2009_v1  ;;  %v2994_v1 = vld [vmem:[#allocation2 + $0x3b4] sm:$0xf0] }
 0x6b9   :  { %v3031_v38 = vpop.eup %3030 }
 0x6ba   :  { %v1989_v26 = vsel %vm888_vm1, %v3031_v38, 0.0 }
 0x6bb   :  { %1990 = vadd.xlane.f32.xlu0 %v1989_v26  ;;  %v2818_v26 = vor.u32 %v2994_v1, %v2817_v10 }
 0x6bd   :  { %2091 = vmatpush.bf16.msra.mxu0 %v2818_v26 }
 0x6c1   :  { %2092 = vmatpush.bf16.msra.mxu0 %v2810_v15 }
 0x6c5   :  { %2093 = vmatpush.bf16.msra.mxu0 %v2802_v22 }
 0x726   :  { %v1836_v21 = vpop.xlane.xlu1 %1835 }
 0x727   :  { %3032 = vrcp.f32 %v1836_v21  ;;  %v1848_v39 = vand.u32 2147483648, %v1836_v21  ;;  %v1846_v40 = vand.u32 2147483647, %v1836_v21  ;;  %vm1842_vm13 = vweird.f32 %v1836_v21 }
 0x729   :  { %v1849_v44 = vor.u32 1.1754944e-38, %v1848_v39  ;;  %vm1847_vm15 = vcmp.eq.f32.partialorder %v1846_v40, 8.507059e+37 }
 0x72d   :  { %v3033_v27 = vpop.eup %3032 }
 0x72e   :  { %v1838_v28 = vmul.f32 %v3033_v27, %v1836_v21  ;;  %v1991_v31 = vpop.xlane.xlu0 %1990  ;;  %vm1843_vm12 = vweird.f32 %v3033_v27  ;;  %v2803_v21 = vld [vmem:[#allocation2 + $0x338] sm:$0xf0] }
 0x72f   :  { %3034 = vrcp.f32 %v1991_v31  ;;  %vm1844_vm14 = vmor %vm1842_vm13, %vm1843_vm12  ;;  %v2003_v57 = vand.u32 2147483648, %v1991_v31  ;;  %v2001_v61 = vand.u32 2147483647, %v1991_v31  ;;  %vm1997_vm3 = vweird.f32 %v1991_v31 }
 0x730   :  { %v1839_v32 = vsub.f32 1.0, %v1838_v28  ;;  %v2806_v24 = vor.u32 %v2989_v20, %v2803_v21 }
 0x731   :  { %v2004_v60 = vor.u32 1.1754944e-38, %v2003_v57  ;;  %vm2002_vm5 = vcmp.eq.f32.partialorder %v2001_v61, 8.507059e+37 }
 0x732   :  { %v1840_v47 = vmul.f32 %v3033_v27, %v1839_v32 }
 0x734   :  { %v1841_v42 = vadd.f32 %v3033_v27, %v1840_v47 }
 0x735   :  { %v3035_v16 = vpop.eup %3034 }
 0x736   :  { %v1845_v37 = vsel %vm1844_vm14, %v3033_v27, %v1841_v42  ;;  %v1993_v49 = vmul.f32 %v3035_v16, %v1991_v31  ;;  %vm1998_vm2 = vweird.f32 %v3035_v16 }
 0x737   :  { %v1850_v50 = vsel %vm1847_vm15, %v1849_v44, %v1845_v37  ;;  %vm1999_vm4 = vmor %vm1997_vm3, %vm1998_vm2 }
 0x738   :  { %v1851_v51 = vmul.f32 %v3029_v5, %v1850_v50  ;;  %v1994_v52 = vsub.f32 1.0, %v1993_v49  ;;  %v2827_v5 = vld [vmem:[#allocation2 + $0x3f8] sm:$0xf0] }
 0x739   :  { %v2830_v9 = vor.u32 %v2995_v7, %v2827_v5 }
 0x73a   :  { %v1995_v45 = vmul.f32 %v3035_v16, %v1994_v52  ;;  %2761 = vmatmul.msk.f32.vlgmr.msrb.gmra.mxu3 %vm888_vm1, %v1851_v51 }
 0x73b   :  { %2103 = vmatpush.bf16.msra.mxu1 %v2830_v9 }
 0x73c   :  { %v1996_v6 = vadd.f32 %v3035_v16, %v1995_v45 }
 0x73e   :  { %v2000_v56 = vsel %vm1999_vm4, %v3035_v16, %v1996_v6 }
 0x73f   :  { %v2005_v63 = vsel %vm2002_vm5, %v2004_v60, %v2000_v56 }
 0x740   :  { %v2006_v29 = vmul.f32 %v3031_v38, %v2005_v63  ;;  %v2993_v38 = vld [vmem:[#allocation2 + $0x39c] sm:$0xf] }
 0x741   :  { %v2822_v8 = vor.u32 %v2993_v38, %v2819_v11 }
 0x742   :  { %2798 = vmatmul.msk.f32.vlgmr.msra.gmra.mxu3 %vm888_vm1, %v2006_v29 }
 0x743   :  { %2104 = vmatpush.bf16.msra.mxu1 %v2822_v8 }
 0x747   :  { %2105 = vmatpush.bf16.msra.mxu1 %v2814_v19 }
 0x74b   :  { %2106 = vmatpush.bf16.msra.mxu1 %v2806_v24 }
 0x7bd   :  { %v1872_v25 = vpop.f32.mrf.mxu3 }
 0x7be   :  { %v1875_v33 = vpack.c.bf16 %v1872_v25, %v1872_v25 }
 0x7c0   :  { %2794 = vmatmul.msk.bf16.vlgmr.msrb.gmra.mxu0 %vm861_vm0, %v1875_v33  ;;  %2795 = vmatmul.msk.bf16.vlgmr.msrb.gmra.mxu1 %vm861_vm0, %v1875_v33 }
 0x7c5   :  { %v2031_v54 = vpop.f32.mrf.mxu3 }
 0x7c6   :  { %v2034_v34 = vpack.c.bf16 %v2031_v54, %v2031_v54 }
 0x7d0   :  { %2831 = vmatmul.msk.bf16.vlgmr.msra.gmra.mxu0 %vm861_vm0, %v2034_v34  ;;  %2832 = vmatmul.msk.bf16.vlgmr.msra.gmra.mxu1 %vm861_vm0, %v2034_v34 }
 0x83d   :  { %v1936_v53 = vpop.f32.mrf.mxu0  ;;  %v1949_v27 = vpop.f32.mrf.mxu1 }
 0x83e   :  { %v1953_v32 = vadd.f32 %v1936_v53, %v3389_v46  ;;  %v1954_v39 = vadd.f32 %v1949_v27, %v3391_v59 }
 0x845   :  { %v1938_v28 = vpop.f32.mrf.mxu0  ;;  %v1951_v31 = vpop.f32.mrf.mxu1 }
 0x84d   :  { %v2095_v47 = vpop.f32.mrf.mxu0  ;;  %v2108_v40 = vpop.f32.mrf.mxu1 }
 0x84e   :  { %v2112_v42 = vadd.f32 %v2095_v47, %v1953_v32  ;;  %v2113_v16 = vadd.f32 %v2108_v40, %v1954_v39 }
 0x850   :  { %v2114_v44 = vadd.f32 %v2112_v42, %v1488_v43  ;;  %v2115_v37 = vadd.f32 %v2113_v16, %v1489_v48 }
 0x852   :  { %2116 = vst [vmem:[#allocation5 + $0x10] sm:$0xff] %v2114_v44 }
 0x853   :  { %2117 = vst [vmem:[#allocation5 + $0x18] sm:$0xff] %v2115_v37 }
 0x854   :  { %2130 = dma.vmem_to_hbm [thread:$0]  %s2123_s11, 512, %s2125_s14, [#allocation4], %s3093_s15, %s3093_s15, %s3094_s16  }
 0x855   :  { %v2097_v46 = vpop.f32.mrf.mxu0  ;;  %v2110_v59 = vpop.f32.mrf.mxu1 }
 0x856   :  { %3086 = dma.done.wait [#allocation4], 512  }
 0x857   :  { %3087 = vsyncadd [#allocation4], 4294966784 }
 0x858   :  { %2135 = vsyncpa [#allocation3], 1 }
 0x859   :  { %2136 = vsyncpa [#allocation4], 1 }

</bundles_post_ra>
